<compile_context>
chip_gen: v5e
topology: v5e:2x2
jax: 0.10.0
libtpu: 0.0.40
codegen_flags: <defaults>
</compile_context>

<pallas_src>
import jax
import jax.numpy as jnp
from jax.experimental import pallas as pl
from jax.experimental.pallas import tpu as pltpu


# -----------------------------------------------------------------------------
# Fused kernel: num_layers LSTM layers + all S attention-decoder steps.
# -----------------------------------------------------------------------------
def _make_fused_kernel(num_layers, S, B, H, I):
    def kernel(*refs):
        # ---- unpack refs: inputs..., outputs..., scratch ----
        x_ref = refs[0]
        idx = 1
        layers = []
        for _ in range(num_layers):
            layers.append((refs[idx], refs[idx + 1], refs[idx + 2]))
            idx += 3
        (wax_ref, wah_ref, ba_ref, wcx_ref, wch_ref, bc_ref,
         wo_ref, bo_ref) = refs[idx:idx + 8]
        out_ref, attn_ref = refs[idx + 8], refs[idx + 9]
        lstm_scr = refs[idx + 10]                     # VMEM (S, B, H) f32

        SB = S * B
        x_all = x_ref[...].astype(jnp.float32)        # (S, B, I)
        x_flat = x_all.reshape(SB, I)                 # (SB, I)

        # ---------------- encoder: num_layers stacked LSTM layers -------------
        cur = x_flat                                  # (SB, in_dim)
        layer_out = None
        for wih_ref, whh_ref, b_ref in layers:
            wih = wih_ref[...]                        # (in_dim, 4H)
            whh = whh_ref[...]                        # (H, 4H)
            bias = b_ref[...]                         # (1, 4H)  (= bih + bhh)

            # Hoisted input path: one matmul for all S timesteps.
            xg = jnp.dot(cur, wih,
                         preferred_element_type=jnp.float32) + bias   # (SB, 4H)

            h = jnp.zeros((B, H), jnp.float32)
            c = jnp.zeros((B, H), jnp.float32)
            # Short static recurrence (S is small); only h@Whh is sequential.
            for t in range(S):
                g = (xg[t * B:(t + 1) * B, :]
                     + jnp.dot(h, whh, preferred_element_type=jnp.float32))  # (B, 4H)
                i_g = jax.nn.sigmoid(g[:, 0:H])
                f_g = jax.nn.sigmoid(g[:, H:2 * H])
                g_g = jnp.tanh(g[:, 2 * H:3 * H])
                o_g = jax.nn.sigmoid(g[:, 3 * H:4 * H])
                c = f_g * c + i_g * g_g
                h = o_g * jnp.tanh(c)
                lstm_scr[t] = h                       # (B, H)

            layer_out = lstm_scr[...]                 # (S, B, H)
            cur = layer_out.reshape(SB, H)

        lstm_out = layer_out                          # (S, B, H), last layer
        h_flat = cur                                  # (SB, H)

        # ---------------- decoder: all S steps vectorized ---------------------
        logits = (jnp.dot(x_flat, wax_ref[...], preferred_element_type=jnp.float32)
                  + jnp.dot(h_flat, wah_ref[...], preferred_element_type=jnp.float32)
                  + ba_ref[...])                      # (SB, S)
        logits = logits - jnp.max(logits, axis=1, keepdims=True)
        e = jnp.exp(logits)
        attn_flat = e / jnp.sum(e, axis=1, keepdims=True)   # (SB, S)
        attn3 = attn_flat.reshape(S, B, S)

        # applied[t, b, :] = attn3[t, b, :] @ lstm_out[:, b, :]  (MXU, per batch elem)
        applied_cols = []
        for b_i in range(B):
            a_b = attn3[:, b_i, :]                    # (S, S)
            l_b = lstm_out[:, b_i, :]                 # (S, H)
            applied_cols.append(
                jnp.dot(a_b, l_b, preferred_element_type=jnp.float32))  # (S, H)
        applied = jnp.stack(applied_cols, axis=1).reshape(SB, H)        # (SB, H)

        comb = (jnp.dot(x_flat, wcx_ref[...], preferred_element_type=jnp.float32)
                + jnp.dot(applied, wch_ref[...], preferred_element_type=jnp.float32)
                + bc_ref[...])                        # (SB, H)
        comb = jnp.maximum(comb, 0.0)
        out = (jnp.dot(comb, wo_ref[...], preferred_element_type=jnp.float32)
               + bo_ref[...])                         # (SB, C)

        out_ref[...] = out.reshape(S, B, -1).astype(out_ref.dtype)
        attn_ref[...] = attn3.astype(attn_ref.dtype)

    return kernel


def fused_forward(params, x):
    """x: (S, B, I) -> (outputs (S,B,C), attn_weights (S,B,S))."""
    S, B, I = x.shape
    lstm = params["lstm"]
    dec = params["dec"]
    num_layers = len(lstm)
    H = lstm[0]["whh_t"].shape[0]
    C = dec["wo_t"].shape[1]

    args = [x]
    for layer in lstm:
        args += [layer["wih_t"], layer["whh_t"], layer["b"]]
    args += [dec["wax_t"], dec["wah_t"], dec["ba"],
             dec["wcx_t"], dec["wch_t"], dec["bc"],
             dec["wo_t"], dec["bo"]]

    kernel = _make_fused_kernel(num_layers, S, B, H, I)
    return pl.pallas_call(
        kernel,
        out_shape=(jax.ShapeDtypeStruct((S, B, C), jnp.float32),
                   jax.ShapeDtypeStruct((S, B, S), jnp.float32)),
        scratch_shapes=[pltpu.VMEM((S, B, H), jnp.float32)],
    )(*args)


# -----------------------------------------------------------------------------
# Parameter construction & full forward
# -----------------------------------------------------------------------------
def init_params(key, input_size, hidden_size, num_layers, num_classes, max_seq_len):
    H, I, S, C = hidden_size, input_size, max_seq_len, num_classes
    ks = iter(jax.random.split(key, 4 * num_layers + 6))

    def rnd(shape):
        return (0.1 * jax.random.normal(next(ks), shape)).astype(jnp.float32)

    lstm = []
    for layer in range(num_layers):
        in_dim = I if layer == 0 else H
        w_ih = rnd((4 * H, in_dim))    # PyTorch layout (4H, in), gates [i; f; g; o]
        w_hh = rnd((4 * H, H))
        b_ih = rnd((4 * H,))
        b_hh = rnd((4 * H,))
        lstm.append(dict(
            wih_t=w_ih.T,                              # (in, 4H)
            whh_t=w_hh.T,                              # (H, 4H)
            b=(b_ih + b_hh).reshape(1, 4 * H),         # pre-combined bias
        ))

    w_attn = rnd((S, I + H))       # nn.Linear(I+H, S)
    b_attn = rnd((S,))
    w_comb = rnd((H, I + H))       # nn.Linear(I+H, H)
    b_comb = rnd((H,))
    w_out = rnd((C, H))            # nn.Linear(H, C)
    b_out = rnd((C,))
    dec = dict(
        wax_t=w_attn[:, :I].T, wah_t=w_attn[:, I:].T, ba=b_attn.reshape(1, S),
        wcx_t=w_comb[:, :I].T, wch_t=w_comb[:, I:].T, bc=b_comb.reshape(1, H),
        wo_t=w_out.T, bo=b_out.reshape(1, C),
    )
    return dict(lstm=lstm, dec=dec)


def lstm_hands_attn_forward(params, seq_batch_coords, seq_lengths):
    # seq_lengths accepted for API parity but unused, as in the PyTorch forward.
    del seq_lengths
    out, attn = fused_forward(params, seq_batch_coords)
    S = seq_batch_coords.shape[0]
    outputs = [out[i] for i in range(S)]               # list of (B, C)
    attn_weights = [attn[i] for i in range(S)]         # list of (B, S)
    return outputs, attn_weights


# -----------------------------------------------------------------------------
# Pure-JAX reference (sanity check only)
# -----------------------------------------------------------------------------
def reference_forward(params, x):
    S, B, _ = x.shape
    cur = x
    for layer in params["lstm"]:
        H4 = layer["whh_t"].shape[1]
        H = H4 // 4
        wih, whh, bias = layer["wih_t"], layer["whh_t"], layer["b"]

        def step(carry, xt):
            h, c = carry
            g = xt @ wih + h @ whh + bias[0]
            i = jax.nn.sigmoid(g[:, :H])
            f = jax.nn.sigmoid(g[:, H:2 * H])
            gg = jnp.tanh(g[:, 2 * H:3 * H])
            o = jax.nn.sigmoid(g[:, 3 * H:])
            c = f * c + i * gg
            h = o * jnp.tanh(c)
            return (h, c), h

        (_, _), cur = jax.lax.scan(
            step, (jnp.zeros((B, H)), jnp.zeros((B, H))), cur)
    lstm_out = cur
    d = params["dec"]
    outs, attns = [], []
    for t in range(S):
        xt, ht = x[t], lstm_out[t]
        logits = xt @ d["wax_t"] + ht @ d["wah_t"] + d["ba"]
        w = jax.nn.softmax(logits, axis=1)
        applied = jnp.einsum("bs,sbh->bh", w, lstm_out)
        comb = jax.nn.relu(xt @ d["wcx_t"] + applied @ d["wch_t"] + d["bc"])
        outs.append(comb @ d["wo_t"] + d["bo"])
        attns.append(w)
    return outs, attns


if __name__ == "__main__":
    # Small shapes consistent with the module: seq-first coords (S, B, input_size)
    input_size, hidden_size, num_layers, num_classes, max_seq_len = 4, 32, 2, 10, 8
    batch = 2

    key = jax.random.PRNGKey(0)
    k_par, k_x = jax.random.split(key)
    params = init_params(k_par, input_size, hidden_size, num_layers,
                         num_classes, max_seq_len)

    seq_batch_coords = jax.random.normal(
        k_x, (max_seq_len, batch, input_size), dtype=jnp.float32)
    seq_lengths = jnp.full((batch,), max_seq_len, dtype=jnp.int32)

    outputs, attn_weights = lstm_hands_attn_forward(params, seq_batch_coords, seq_lengths)
    jax.block_until_ready(outputs)
    jax.block_until_ready(attn_weights)

    # Sanity check vs pure-JAX reference
    ref_outputs, ref_attn = reference_forward(params, seq_batch_coords)
    for a, b in zip(outputs, ref_outputs):
        assert jnp.allclose(a, b, rtol=2e-3, atol=2e-3), "output mismatch"
    for a, b in zip(attn_weights, ref_attn):
        assert jnp.allclose(a, b, rtol=2e-3, atol=2e-3), "attn mismatch"

    print("KERNEL_OK")
</pallas_src>

<mosaic_0001>
module attributes {stable_mosaic.version = 11 : i64} {
  func.func @kernel(%arg0: memref<8x2x4xf32, #tpu.memory_space<vmem>>, %arg1: memref<4x128xf32, #tpu.memory_space<vmem>>, %arg2: memref<32x128xf32, #tpu.memory_space<vmem>>, %arg3: memref<1x128xf32, #tpu.memory_space<vmem>>, %arg4: memref<32x128xf32, #tpu.memory_space<vmem>>, %arg5: memref<32x128xf32, #tpu.memory_space<vmem>>, %arg6: memref<1x128xf32, #tpu.memory_space<vmem>>, %arg7: memref<4x8xf32, #tpu.memory_space<vmem>>, %arg8: memref<32x8xf32, #tpu.memory_space<vmem>>, %arg9: memref<1x8xf32, #tpu.memory_space<vmem>>, %arg10: memref<4x32xf32, #tpu.memory_space<vmem>>, %arg11: memref<32x32xf32, #tpu.memory_space<vmem>>, %arg12: memref<1x32xf32, #tpu.memory_space<vmem>>, %arg13: memref<32x10xf32, #tpu.memory_space<vmem>>, %arg14: memref<1x10xf32, #tpu.memory_space<vmem>>, %arg15: memref<8x2x10xf32, #tpu.memory_space<vmem>>, %arg16: memref<8x2x8xf32, #tpu.memory_space<vmem>>, %arg17: memref<8x2x32xf32, #tpu.memory_space<vmem>>) attributes {dimension_semantics = [], scalar_prefetch = 0 : i64, scratch_operands = 1 : i64, tpu.core_type = #tpu.core_type<tc>} {
    %c0 = arith.constant 0 : index
    %c0_0 = arith.constant 0 : index
    %c0_1 = arith.constant 0 : index
    %0 = vector.load %arg0[%c0, %c0_0, %c0_1] : memref<8x2x4xf32, #tpu.memory_space<vmem>>, vector<8x2x4xf32>
    %1 = vector.shape_cast %0 : vector<8x2x4xf32> to vector<16x4xf32>
    %c0_2 = arith.constant 0 : index
    %c0_3 = arith.constant 0 : index
    %2 = vector.load %arg1[%c0_2, %c0_3] : memref<4x128xf32, #tpu.memory_space<vmem>>, vector<4x128xf32>
    %c0_4 = arith.constant 0 : index
    %c0_5 = arith.constant 0 : index
    %3 = vector.load %arg2[%c0_4, %c0_5] : memref<32x128xf32, #tpu.memory_space<vmem>>, vector<32x128xf32>
    %c0_6 = arith.constant 0 : index
    %c0_7 = arith.constant 0 : index
    %4 = vector.load %arg3[%c0_6, %c0_7] : memref<1x128xf32, #tpu.memory_space<vmem>>, vector<1x128xf32>
    %cst = arith.constant dense<0.000000e+00> : vector<16x128xf32>
    %5 = tpu.matmul %1, %2, %cst {dimension_numbers = #tpu.dot_dimension_numbers<[1], [0], [0], [1], [0, 0, 1, 1], [], []>} : vector<16x4xf32>, vector<4x128xf32>, vector<16x128xf32> -> vector<16x128xf32>
    %6 = vector.broadcast %4 : vector<1x128xf32> to vector<16x128xf32>
    %7 = arith.addf %5, %6 : vector<16x128xf32>
    %cst_8 = arith.constant 0.000000e+00 : f32
    %8 = vector.broadcast %cst_8 : f32 to vector<2x32xf32>
    %cst_9 = arith.constant 0.000000e+00 : f32
    %9 = vector.broadcast %cst_9 : f32 to vector<2x32xf32>
    %10 = vector.extract_strided_slice %7 {offsets = [0, 0], sizes = [2, 128], strides = [1, 1]} : vector<16x128xf32> to vector<2x128xf32>
    %cst_10 = arith.constant dense<0.000000e+00> : vector<2x128xf32>
    %11 = tpu.matmul %8, %3, %cst_10 {dimension_numbers = #tpu.dot_dimension_numbers<[1], [0], [0], [1], [0, 0, 1, 1], [], []>} : vector<2x32xf32>, vector<32x128xf32>, vector<2x128xf32> -> vector<2x128xf32>
    %12 = arith.addf %10, %11 : vector<2x128xf32>
    %13 = vector.extract_strided_slice %12 {offsets = [0, 0], sizes = [2, 32], strides = [1, 1]} : vector<2x128xf32> to vector<2x32xf32>
    %14 = arith.negf %13 : vector<2x32xf32>
    %15 = math.exp %14 : vector<2x32xf32>
    %cst_11 = arith.constant 1.000000e+00 : f32
    %16 = vector.broadcast %cst_11 : f32 to vector<2x32xf32>
    %17 = arith.addf %16, %15 : vector<2x32xf32>
    %18 = arith.divf %16, %17 : vector<2x32xf32>
    %19 = vector.extract_strided_slice %12 {offsets = [0, 32], sizes = [2, 32], strides = [1, 1]} : vector<2x128xf32> to vector<2x32xf32>
    %20 = arith.negf %19 : vector<2x32xf32>
    %21 = math.exp %20 : vector<2x32xf32>
    %cst_12 = arith.constant 1.000000e+00 : f32
    %22 = vector.broadcast %cst_12 : f32 to vector<2x32xf32>
    %23 = arith.addf %22, %21 : vector<2x32xf32>
    %24 = arith.divf %22, %23 : vector<2x32xf32>
    %25 = vector.extract_strided_slice %12 {offsets = [0, 64], sizes = [2, 32], strides = [1, 1]} : vector<2x128xf32> to vector<2x32xf32>
    %26 = math.tanh %25 : vector<2x32xf32>
    %27 = vector.extract_strided_slice %12 {offsets = [0, 96], sizes = [2, 32], strides = [1, 1]} : vector<2x128xf32> to vector<2x32xf32>
    %28 = arith.negf %27 : vector<2x32xf32>
    %29 = math.exp %28 : vector<2x32xf32>
    %cst_13 = arith.constant 1.000000e+00 : f32
    %30 = vector.broadcast %cst_13 : f32 to vector<2x32xf32>
    %31 = arith.addf %30, %29 : vector<2x32xf32>
    %32 = arith.divf %30, %31 : vector<2x32xf32>
    %33 = arith.mulf %24, %9 : vector<2x32xf32>
    %34 = arith.mulf %18, %26 : vector<2x32xf32>
    %35 = arith.addf %33, %34 : vector<2x32xf32>
    %36 = math.tanh %35 : vector<2x32xf32>
    %37 = arith.mulf %32, %36 : vector<2x32xf32>
    %c0_14 = arith.constant 0 : index
    %c0_15 = arith.constant 0 : index
    %c0_16 = arith.constant 0 : index
    %38 = vector.load %arg17[%c0_14, %c0_15, %c0_16] : memref<8x2x32xf32, #tpu.memory_space<vmem>>, vector<1x2x32xf32>
    %39 = vector.shape_cast %38 : vector<1x2x32xf32> to vector<2x32xf32>
    %40 = vector.shape_cast %37 : vector<2x32xf32> to vector<1x2x32xf32>
    tpu.vector_store %arg17[%c0_14, %c0_15, %c0_16], %40 {strides = array<i32>} : memref<8x2x32xf32, #tpu.memory_space<vmem>>, vector<1x2x32xf32>,
    %41 = vector.extract_strided_slice %7 {offsets = [2, 0], sizes = [2, 128], strides = [1, 1]} : vector<16x128xf32> to vector<2x128xf32>
    %cst_17 = arith.constant dense<0.000000e+00> : vector<2x128xf32>
    %42 = tpu.matmul %37, %3, %cst_17 {dimension_numbers = #tpu.dot_dimension_numbers<[1], [0], [0], [1], [0, 0, 1, 1], [], []>} : vector<2x32xf32>, vector<32x128xf32>, vector<2x128xf32> -> vector<2x128xf32>
    %43 = arith.addf %41, %42 : vector<2x128xf32>
    %44 = vector.extract_strided_slice %43 {offsets = [0, 0], sizes = [2, 32], strides = [1, 1]} : vector<2x128xf32> to vector<2x32xf32>
    %45 = arith.negf %44 : vector<2x32xf32>
    %46 = math.exp %45 : vector<2x32xf32>
    %cst_18 = arith.constant 1.000000e+00 : f32
    %47 = vector.broadcast %cst_18 : f32 to vector<2x32xf32>
    %48 = arith.addf %47, %46 : vector<2x32xf32>
    %49 = arith.divf %47, %48 : vector<2x32xf32>
    %50 = vector.extract_strided_slice %43 {offsets = [0, 32], sizes = [2, 32], strides = [1, 1]} : vector<2x128xf32> to vector<2x32xf32>
    %51 = arith.negf %50 : vector<2x32xf32>
    %52 = math.exp %51 : vector<2x32xf32>
    %cst_19 = arith.constant 1.000000e+00 : f32
    %53 = vector.broadcast %cst_19 : f32 to vector<2x32xf32>
    %54 = arith.addf %53, %52 : vector<2x32xf32>
    %55 = arith.divf %53, %54 : vector<2x32xf32>
    %56 = vector.extract_strided_slice %43 {offsets = [0, 64], sizes = [2, 32], strides = [1, 1]} : vector<2x128xf32> to vector<2x32xf32>
    %57 = math.tanh %56 : vector<2x32xf32>
    %58 = vector.extract_strided_slice %43 {offsets = [0, 96], sizes = [2, 32], strides = [1, 1]} : vector<2x128xf32> to vector<2x32xf32>
    %59 = arith.negf %58 : vector<2x32xf32>
    %60 = math.exp %59 : vector<2x32xf32>
    %cst_20 = arith.constant 1.000000e+00 : f32
    %61 = vector.broadcast %cst_20 : f32 to vector<2x32xf32>
    %62 = arith.addf %61, %60 : vector<2x32xf32>
    %63 = arith.divf %61, %62 : vector<2x32xf32>
    %64 = arith.mulf %55, %35 : vector<2x32xf32>
    %65 = arith.mulf %49, %57 : vector<2x32xf32>
    %66 = arith.addf %64, %65 : vector<2x32xf32>
    %67 = math.tanh %66 : vector<2x32xf32>
    %68 = arith.mulf %63, %67 : vector<2x32xf32>
    %c1 = arith.constant 1 : index
    %c0_21 = arith.constant 0 : index
    %c0_22 = arith.constant 0 : index
    %69 = vector.load %arg17[%c1, %c0_21, %c0_22] : memref<8x2x32xf32, #tpu.memory_space<vmem>>, vector<1x2x32xf32>
    %70 = vector.shape_cast %69 : vector<1x2x32xf32> to vector<2x32xf32>
    %71 = vector.shape_cast %68 : vector<2x32xf32> to vector<1x2x32xf32>
    tpu.vector_store %arg17[%c1, %c0_21, %c0_22], %71 {strides = array<i32>} : memref<8x2x32xf32, #tpu.memory_space<vmem>>, vector<1x2x32xf32>,
    %72 = vector.extract_strided_slice %7 {offsets = [4, 0], sizes = [2, 128], strides = [1, 1]} : vector<16x128xf32> to vector<2x128xf32>
    %cst_23 = arith.constant dense<0.000000e+00> : vector<2x128xf32>
    %73 = tpu.matmul %68, %3, %cst_23 {dimension_numbers = #tpu.dot_dimension_numbers<[1], [0], [0], [1], [0, 0, 1, 1], [], []>} : vector<2x32xf32>, vector<32x128xf32>, vector<2x128xf32> -> vector<2x128xf32>
    %74 = arith.addf %72, %73 : vector<2x128xf32>
    %75 = vector.extract_strided_slice %74 {offsets = [0, 0], sizes = [2, 32], strides = [1, 1]} : vector<2x128xf32> to vector<2x32xf32>
    %76 = arith.negf %75 : vector<2x32xf32>
    %77 = math.exp %76 : vector<2x32xf32>
    %cst_24 = arith.constant 1.000000e+00 : f32
    %78 = vector.broadcast %cst_24 : f32 to vector<2x32xf32>
    %79 = arith.addf %78, %77 : vector<2x32xf32>
    %80 = arith.divf %78, %79 : vector<2x32xf32>
    %81 = vector.extract_strided_slice %74 {offsets = [0, 32], sizes = [2, 32], strides = [1, 1]} : vector<2x128xf32> to vector<2x32xf32>
    %82 = arith.negf %81 : vector<2x32xf32>
    %83 = math.exp %82 : vector<2x32xf32>
    %cst_25 = arith.constant 1.000000e+00 : f32
    %84 = vector.broadcast %cst_25 : f32 to vector<2x32xf32>
    %85 = arith.addf %84, %83 : vector<2x32xf32>
    %86 = arith.divf %84, %85 : vector<2x32xf32>
    %87 = vector.extract_strided_slice %74 {offsets = [0, 64], sizes = [2, 32], strides = [1, 1]} : vector<2x128xf32> to vector<2x32xf32>
    %88 = math.tanh %87 : vector<2x32xf32>
    %89 = vector.extract_strided_slice %74 {offsets = [0, 96], sizes = [2, 32], strides = [1, 1]} : vector<2x128xf32> to vector<2x32xf32>
    %90 = arith.negf %89 : vector<2x32xf32>
    %91 = math.exp %90 : vector<2x32xf32>
    %cst_26 = arith.constant 1.000000e+00 : f32
    %92 = vector.broadcast %cst_26 : f32 to vector<2x32xf32>
    %93 = arith.addf %92, %91 : vector<2x32xf32>
    %94 = arith.divf %92, %93 : vector<2x32xf32>
    %95 = arith.mulf %86, %66 : vector<2x32xf32>
    %96 = arith.mulf %80, %88 : vector<2x32xf32>
    %97 = arith.addf %95, %96 : vector<2x32xf32>
    %98 = math.tanh %97 : vector<2x32xf32>
    %99 = arith.mulf %94, %98 : vector<2x32xf32>
    %c2 = arith.constant 2 : index
    %c0_27 = arith.constant 0 : index
    %c0_28 = arith.constant 0 : index
    %100 = vector.load %arg17[%c2, %c0_27, %c0_28] : memref<8x2x32xf32, #tpu.memory_space<vmem>>, vector<1x2x32xf32>
    %101 = vector.shape_cast %100 : vector<1x2x32xf32> to vector<2x32xf32>
    %102 = vector.shape_cast %99 : vector<2x32xf32> to vector<1x2x32xf32>
    tpu.vector_store %arg17[%c2, %c0_27, %c0_28], %102 {strides = array<i32>} : memref<8x2x32xf32, #tpu.memory_space<vmem>>, vector<1x2x32xf32>,
    %103 = vector.extract_strided_slice %7 {offsets = [6, 0], sizes = [2, 128], strides = [1, 1]} : vector<16x128xf32> to vector<2x128xf32>
    %cst_29 = arith.constant dense<0.000000e+00> : vector<2x128xf32>
    %104 = tpu.matmul %99, %3, %cst_29 {dimension_numbers = #tpu.dot_dimension_numbers<[1], [0], [0], [1], [0, 0, 1, 1], [], []>} : vector<2x32xf32>, vector<32x128xf32>, vector<2x128xf32> -> vector<2x128xf32>
    %105 = arith.addf %103, %104 : vector<2x128xf32>
    %106 = vector.extract_strided_slice %105 {offsets = [0, 0], sizes = [2, 32], strides = [1, 1]} : vector<2x128xf32> to vector<2x32xf32>
    %107 = arith.negf %106 : vector<2x32xf32>
    %108 = math.exp %107 : vector<2x32xf32>
    %cst_30 = arith.constant 1.000000e+00 : f32
    %109 = vector.broadcast %cst_30 : f32 to vector<2x32xf32>
    %110 = arith.addf %109, %108 : vector<2x32xf32>
    %111 = arith.divf %109, %110 : vector<2x32xf32>
    %112 = vector.extract_strided_slice %105 {offsets = [0, 32], sizes = [2, 32], strides = [1, 1]} : vector<2x128xf32> to vector<2x32xf32>
    %113 = arith.negf %112 : vector<2x32xf32>
    %114 = math.exp %113 : vector<2x32xf32>
    %cst_31 = arith.constant 1.000000e+00 : f32
    %115 = vector.broadcast %cst_31 : f32 to vector<2x32xf32>
    %116 = arith.addf %115, %114 : vector<2x32xf32>
    %117 = arith.divf %115, %116 : vector<2x32xf32>
    %118 = vector.extract_strided_slice %105 {offsets = [0, 64], sizes = [2, 32], strides = [1, 1]} : vector<2x128xf32> to vector<2x32xf32>
    %119 = math.tanh %118 : vector<2x32xf32>
    %120 = vector.extract_strided_slice %105 {offsets = [0, 96], sizes = [2, 32], strides = [1, 1]} : vector<2x128xf32> to vector<2x32xf32>
    %121 = arith.negf %120 : vector<2x32xf32>
    %122 = math.exp %121 : vector<2x32xf32>
    %cst_32 = arith.constant 1.000000e+00 : f32
    %123 = vector.broadcast %cst_32 : f32 to vector<2x32xf32>
    %124 = arith.addf %123, %122 : vector<2x32xf32>
    %125 = arith.divf %123, %124 : vector<2x32xf32>
    %126 = arith.mulf %117, %97 : vector<2x32xf32>
    %127 = arith.mulf %111, %119 : vector<2x32xf32>
    %128 = arith.addf %126, %127 : vector<2x32xf32>
    %129 = math.tanh %128 : vector<2x32xf32>
    %130 = arith.mulf %125, %129 : vector<2x32xf32>
    %c3 = arith.constant 3 : index
    %c0_33 = arith.constant 0 : index
    %c0_34 = arith.constant 0 : index
    %131 = vector.load %arg17[%c3, %c0_33, %c0_34] : memref<8x2x32xf32, #tpu.memory_space<vmem>>, vector<1x2x32xf32>
    %132 = vector.shape_cast %131 : vector<1x2x32xf32> to vector<2x32xf32>
    %133 = vector.shape_cast %130 : vector<2x32xf32> to vector<1x2x32xf32>
    tpu.vector_store %arg17[%c3, %c0_33, %c0_34], %133 {strides = array<i32>} : memref<8x2x32xf32, #tpu.memory_space<vmem>>, vector<1x2x32xf32>,
    %134 = vector.extract_strided_slice %7 {offsets = [8, 0], sizes = [2, 128], strides = [1, 1]} : vector<16x128xf32> to vector<2x128xf32>
    %cst_35 = arith.constant dense<0.000000e+00> : vector<2x128xf32>
    %135 = tpu.matmul %130, %3, %cst_35 {dimension_numbers = #tpu.dot_dimension_numbers<[1], [0], [0], [1], [0, 0, 1, 1], [], []>} : vector<2x32xf32>, vector<32x128xf32>, vector<2x128xf32> -> vector<2x128xf32>
    %136 = arith.addf %134, %135 : vector<2x128xf32>
    %137 = vector.extract_strided_slice %136 {offsets = [0, 0], sizes = [2, 32], strides = [1, 1]} : vector<2x128xf32> to vector<2x32xf32>
    %138 = arith.negf %137 : vector<2x32xf32>
    %139 = math.exp %138 : vector<2x32xf32>
    %cst_36 = arith.constant 1.000000e+00 : f32
    %140 = vector.broadcast %cst_36 : f32 to vector<2x32xf32>
    %141 = arith.addf %140, %139 : vector<2x32xf32>
    %142 = arith.divf %140, %141 : vector<2x32xf32>
    %143 = vector.extract_strided_slice %136 {offsets = [0, 32], sizes = [2, 32], strides = [1, 1]} : vector<2x128xf32> to vector<2x32xf32>
    %144 = arith.negf %143 : vector<2x32xf32>
    %145 = math.exp %144 : vector<2x32xf32>
    %cst_37 = arith.constant 1.000000e+00 : f32
    %146 = vector.broadcast %cst_37 : f32 to vector<2x32xf32>
    %147 = arith.addf %146, %145 : vector<2x32xf32>
    %148 = arith.divf %146, %147 : vector<2x32xf32>
    %149 = vector.extract_strided_slice %136 {offsets = [0, 64], sizes = [2, 32], strides = [1, 1]} : vector<2x128xf32> to vector<2x32xf32>
    %150 = math.tanh %149 : vector<2x32xf32>
    %151 = vector.extract_strided_slice %136 {offsets = [0, 96], sizes = [2, 32], strides = [1, 1]} : vector<2x128xf32> to vector<2x32xf32>
    %152 = arith.negf %151 : vector<2x32xf32>
    %153 = math.exp %152 : vector<2x32xf32>
    %cst_38 = arith.constant 1.000000e+00 : f32
    %154 = vector.broadcast %cst_38 : f32 to vector<2x32xf32>
    %155 = arith.addf %154, %153 : vector<2x32xf32>
    %156 = arith.divf %154, %155 : vector<2x32xf32>
    %157 = arith.mulf %148, %128 : vector<2x32xf32>
    %158 = arith.mulf %142, %150 : vector<2x32xf32>
    %159 = arith.addf %157, %158 : vector<2x32xf32>
    %160 = math.tanh %159 : vector<2x32xf32>
    %161 = arith.mulf %156, %160 : vector<2x32xf32>
    %c4 = arith.constant 4 : index
    %c0_39 = arith.constant 0 : index
    %c0_40 = arith.constant 0 : index
    %162 = vector.load %arg17[%c4, %c0_39, %c0_40] : memref<8x2x32xf32, #tpu.memory_space<vmem>>, vector<1x2x32xf32>
    %163 = vector.shape_cast %162 : vector<1x2x32xf32> to vector<2x32xf32>
    %164 = vector.shape_cast %161 : vector<2x32xf32> to vector<1x2x32xf32>
    tpu.vector_store %arg17[%c4, %c0_39, %c0_40], %164 {strides = array<i32>} : memref<8x2x32xf32, #tpu.memory_space<vmem>>, vector<1x2x32xf32>,
    %165 = vector.extract_strided_slice %7 {offsets = [10, 0], sizes = [2, 128], strides = [1, 1]} : vector<16x128xf32> to vector<2x128xf32>
    %cst_41 = arith.constant dense<0.000000e+00> : vector<2x128xf32>
    %166 = tpu.matmul %161, %3, %cst_41 {dimension_numbers = #tpu.dot_dimension_numbers<[1], [0], [0], [1], [0, 0, 1, 1], [], []>} : vector<2x32xf32>, vector<32x128xf32>, vector<2x128xf32> -> vector<2x128xf32>
    %167 = arith.addf %165, %166 : vector<2x128xf32>
    %168 = vector.extract_strided_slice %167 {offsets = [0, 0], sizes = [2, 32], strides = [1, 1]} : vector<2x128xf32> to vector<2x32xf32>
    %169 = arith.negf %168 : vector<2x32xf32>
    %170 = math.exp %169 : vector<2x32xf32>
    %cst_42 = arith.constant 1.000000e+00 : f32
    %171 = vector.broadcast %cst_42 : f32 to vector<2x32xf32>
    %172 = arith.addf %171, %170 : vector<2x32xf32>
    %173 = arith.divf %171, %172 : vector<2x32xf32>
    %174 = vector.extract_strided_slice %167 {offsets = [0, 32], sizes = [2, 32], strides = [1, 1]} : vector<2x128xf32> to vector<2x32xf32>
    %175 = arith.negf %174 : vector<2x32xf32>
    %176 = math.exp %175 : vector<2x32xf32>
    %cst_43 = arith.constant 1.000000e+00 : f32
    %177 = vector.broadcast %cst_43 : f32 to vector<2x32xf32>
    %178 = arith.addf %177, %176 : vector<2x32xf32>
    %179 = arith.divf %177, %178 : vector<2x32xf32>
    %180 = vector.extract_strided_slice %167 {offsets = [0, 64], sizes = [2, 32], strides = [1, 1]} : vector<2x128xf32> to vector<2x32xf32>
    %181 = math.tanh %180 : vector<2x32xf32>
    %182 = vector.extract_strided_slice %167 {offsets = [0, 96], sizes = [2, 32], strides = [1, 1]} : vector<2x128xf32> to vector<2x32xf32>
    %183 = arith.negf %182 : vector<2x32xf32>
    %184 = math.exp %183 : vector<2x32xf32>
    %cst_44 = arith.constant 1.000000e+00 : f32
    %185 = vector.broadcast %cst_44 : f32 to vector<2x32xf32>
    %186 = arith.addf %185, %184 : vector<2x32xf32>
    %187 = arith.divf %185, %186 : vector<2x32xf32>
    %188 = arith.mulf %179, %159 : vector<2x32xf32>
    %189 = arith.mulf %173, %181 : vector<2x32xf32>
    %190 = arith.addf %188, %189 : vector<2x32xf32>
    %191 = math.tanh %190 : vector<2x32xf32>
    %192 = arith.mulf %187, %191 : vector<2x32xf32>
    %c5 = arith.constant 5 : index
    %c0_45 = arith.constant 0 : index
    %c0_46 = arith.constant 0 : index
    %193 = vector.load %arg17[%c5, %c0_45, %c0_46] : memref<8x2x32xf32, #tpu.memory_space<vmem>>, vector<1x2x32xf32>
    %194 = vector.shape_cast %193 : vector<1x2x32xf32> to vector<2x32xf32>
    %195 = vector.shape_cast %192 : vector<2x32xf32> to vector<1x2x32xf32>
    tpu.vector_store %arg17[%c5, %c0_45, %c0_46], %195 {strides = array<i32>} : memref<8x2x32xf32, #tpu.memory_space<vmem>>, vector<1x2x32xf32>,
    %196 = vector.extract_strided_slice %7 {offsets = [12, 0], sizes = [2, 128], strides = [1, 1]} : vector<16x128xf32> to vector<2x128xf32>
    %cst_47 = arith.constant dense<0.000000e+00> : vector<2x128xf32>
    %197 = tpu.matmul %192, %3, %cst_47 {dimension_numbers = #tpu.dot_dimension_numbers<[1], [0], [0], [1], [0, 0, 1, 1], [], []>} : vector<2x32xf32>, vector<32x128xf32>, vector<2x128xf32> -> vector<2x128xf32>
    %198 = arith.addf %196, %197 : vector<2x128xf32>
    %199 = vector.extract_strided_slice %198 {offsets = [0, 0], sizes = [2, 32], strides = [1, 1]} : vector<2x128xf32> to vector<2x32xf32>
    %200 = arith.negf %199 : vector<2x32xf32>
    %201 = math.exp %200 : vector<2x32xf32>
    %cst_48 = arith.constant 1.000000e+00 : f32
    %202 = vector.broadcast %cst_48 : f32 to vector<2x32xf32>
    %203 = arith.addf %202, %201 : vector<2x32xf32>
    %204 = arith.divf %202, %203 : vector<2x32xf32>
    %205 = vector.extract_strided_slice %198 {offsets = [0, 32], sizes = [2, 32], strides = [1, 1]} : vector<2x128xf32> to vector<2x32xf32>
    %206 = arith.negf %205 : vector<2x32xf32>
    %207 = math.exp %206 : vector<2x32xf32>
    %cst_49 = arith.constant 1.000000e+00 : f32
    %208 = vector.broadcast %cst_49 : f32 to vector<2x32xf32>
    %209 = arith.addf %208, %207 : vector<2x32xf32>
    %210 = arith.divf %208, %209 : vector<2x32xf32>
    %211 = vector.extract_strided_slice %198 {offsets = [0, 64], sizes = [2, 32], strides = [1, 1]} : vector<2x128xf32> to vector<2x32xf32>
    %212 = math.tanh %211 : vector<2x32xf32>
    %213 = vector.extract_strided_slice %198 {offsets = [0, 96], sizes = [2, 32], strides = [1, 1]} : vector<2x128xf32> to vector<2x32xf32>
    %214 = arith.negf %213 : vector<2x32xf32>
    %215 = math.exp %214 : vector<2x32xf32>
    %cst_50 = arith.constant 1.000000e+00 : f32
    %216 = vector.broadcast %cst_50 : f32 to vector<2x32xf32>
    %217 = arith.addf %216, %215 : vector<2x32xf32>
    %218 = arith.divf %216, %217 : vector<2x32xf32>
    %219 = arith.mulf %210, %190 : vector<2x32xf32>
    %220 = arith.mulf %204, %212 : vector<2x32xf32>
    %221 = arith.addf %219, %220 : vector<2x32xf32>
    %222 = math.tanh %221 : vector<2x32xf32>
    %223 = arith.mulf %218, %222 : vector<2x32xf32>
    %c6 = arith.constant 6 : index
    %c0_51 = arith.constant 0 : index
    %c0_52 = arith.constant 0 : index
    %224 = vector.load %arg17[%c6, %c0_51, %c0_52] : memref<8x2x32xf32, #tpu.memory_space<vmem>>, vector<1x2x32xf32>
    %225 = vector.shape_cast %224 : vector<1x2x32xf32> to vector<2x32xf32>
    %226 = vector.shape_cast %223 : vector<2x32xf32> to vector<1x2x32xf32>
    tpu.vector_store %arg17[%c6, %c0_51, %c0_52], %226 {strides = array<i32>} : memref<8x2x32xf32, #tpu.memory_space<vmem>>, vector<1x2x32xf32>,
    %227 = vector.extract_strided_slice %7 {offsets = [14, 0], sizes = [2, 128], strides = [1, 1]} : vector<16x128xf32> to vector<2x128xf32>
    %cst_53 = arith.constant dense<0.000000e+00> : vector<2x128xf32>
    %228 = tpu.matmul %223, %3, %cst_53 {dimension_numbers = #tpu.dot_dimension_numbers<[1], [0], [0], [1], [0, 0, 1, 1], [], []>} : vector<2x32xf32>, vector<32x128xf32>, vector<2x128xf32> -> vector<2x128xf32>
    %229 = arith.addf %227, %228 : vector<2x128xf32>
    %230 = vector.extract_strided_slice %229 {offsets = [0, 0], sizes = [2, 32], strides = [1, 1]} : vector<2x128xf32> to vector<2x32xf32>
    %231 = arith.negf %230 : vector<2x32xf32>
    %232 = math.exp %231 : vector<2x32xf32>
    %cst_54 = arith.constant 1.000000e+00 : f32
    %233 = vector.broadcast %cst_54 : f32 to vector<2x32xf32>
    %234 = arith.addf %233, %232 : vector<2x32xf32>
    %235 = arith.divf %233, %234 : vector<2x32xf32>
    %236 = vector.extract_strided_slice %229 {offsets = [0, 32], sizes = [2, 32], strides = [1, 1]} : vector<2x128xf32> to vector<2x32xf32>
    %237 = arith.negf %236 : vector<2x32xf32>
    %238 = math.exp %237 : vector<2x32xf32>
    %cst_55 = arith.constant 1.000000e+00 : f32
    %239 = vector.broadcast %cst_55 : f32 to vector<2x32xf32>
    %240 = arith.addf %239, %238 : vector<2x32xf32>
    %241 = arith.divf %239, %240 : vector<2x32xf32>
    %242 = vector.extract_strided_slice %229 {offsets = [0, 64], sizes = [2, 32], strides = [1, 1]} : vector<2x128xf32> to vector<2x32xf32>
    %243 = math.tanh %242 : vector<2x32xf32>
    %244 = vector.extract_strided_slice %229 {offsets = [0, 96], sizes = [2, 32], strides = [1, 1]} : vector<2x128xf32> to vector<2x32xf32>
    %245 = arith.negf %244 : vector<2x32xf32>
    %246 = math.exp %245 : vector<2x32xf32>
    %cst_56 = arith.constant 1.000000e+00 : f32
    %247 = vector.broadcast %cst_56 : f32 to vector<2x32xf32>
    %248 = arith.addf %247, %246 : vector<2x32xf32>
    %249 = arith.divf %247, %248 : vector<2x32xf32>
    %250 = arith.mulf %241, %221 : vector<2x32xf32>
    %251 = arith.mulf %235, %243 : vector<2x32xf32>
    %252 = arith.addf %250, %251 : vector<2x32xf32>
    %253 = math.tanh %252 : vector<2x32xf32>
    %254 = arith.mulf %249, %253 : vector<2x32xf32>
    %c7 = arith.constant 7 : index
    %c0_57 = arith.constant 0 : index
    %c0_58 = arith.constant 0 : index
    %255 = vector.load %arg17[%c7, %c0_57, %c0_58] : memref<8x2x32xf32, #tpu.memory_space<vmem>>, vector<1x2x32xf32>
    %256 = vector.shape_cast %255 : vector<1x2x32xf32> to vector<2x32xf32>
    %257 = vector.shape_cast %254 : vector<2x32xf32> to vector<1x2x32xf32>
    tpu.vector_store %arg17[%c7, %c0_57, %c0_58], %257 {strides = array<i32>} : memref<8x2x32xf32, #tpu.memory_space<vmem>>, vector<1x2x32xf32>,
    %c0_59 = arith.constant 0 : index
    %c0_60 = arith.constant 0 : index
    %c0_61 = arith.constant 0 : index
    %258 = vector.load %arg17[%c0_59, %c0_60, %c0_61] : memref<8x2x32xf32, #tpu.memory_space<vmem>>, vector<8x2x32xf32>
    %259 = vector.shape_cast %258 : vector<8x2x32xf32> to vector<16x32xf32>
    %c0_62 = arith.constant 0 : index
    %c0_63 = arith.constant 0 : index
    %260 = vector.load %arg4[%c0_62, %c0_63] : memref<32x128xf32, #tpu.memory_space<vmem>>, vector<32x128xf32>
    %c0_64 = arith.constant 0 : index
    %c0_65 = arith.constant 0 : index
    %261 = vector.load %arg5[%c0_64, %c0_65] : memref<32x128xf32, #tpu.memory_space<vmem>>, vector<32x128xf32>
    %c0_66 = arith.constant 0 : index
    %c0_67 = arith.constant 0 : index
    %262 = vector.load %arg6[%c0_66, %c0_67] : memref<1x128xf32, #tpu.memory_space<vmem>>, vector<1x128xf32>
    %cst_68 = arith.constant dense<0.000000e+00> : vector<16x128xf32>
    %263 = tpu.matmul %259, %260, %cst_68 {dimension_numbers = #tpu.dot_dimension_numbers<[1], [0], [0], [1], [0, 0, 1, 1], [], []>} : vector<16x32xf32>, vector<32x128xf32>, vector<16x128xf32> -> vector<16x128xf32>
    %264 = vector.broadcast %262 : vector<1x128xf32> to vector<16x128xf32>
    %265 = arith.addf %263, %264 : vector<16x128xf32>
    %cst_69 = arith.constant 0.000000e+00 : f32
    %266 = vector.broadcast %cst_69 : f32 to vector<2x32xf32>
    %cst_70 = arith.constant 0.000000e+00 : f32
    %267 = vector.broadcast %cst_70 : f32 to vector<2x32xf32>
    %268 = vector.extract_strided_slice %265 {offsets = [0, 0], sizes = [2, 128], strides = [1, 1]} : vector<16x128xf32> to vector<2x128xf32>
    %cst_71 = arith.constant dense<0.000000e+00> : vector<2x128xf32>
    %269 = tpu.matmul %266, %261, %cst_71 {dimension_numbers = #tpu.dot_dimension_numbers<[1], [0], [0], [1], [0, 0, 1, 1], [], []>} : vector<2x32xf32>, vector<32x128xf32>, vector<2x128xf32> -> vector<2x128xf32>
    %270 = arith.addf %268, %269 : vector<2x128xf32>
    %271 = vector.extract_strided_slice %270 {offsets = [0, 0], sizes = [2, 32], strides = [1, 1]} : vector<2x128xf32> to vector<2x32xf32>
    %272 = arith.negf %271 : vector<2x32xf32>
    %273 = math.exp %272 : vector<2x32xf32>
    %cst_72 = arith.constant 1.000000e+00 : f32
    %274 = vector.broadcast %cst_72 : f32 to vector<2x32xf32>
    %275 = arith.addf %274, %273 : vector<2x32xf32>
    %276 = arith.divf %274, %275 : vector<2x32xf32>
    %277 = vector.extract_strided_slice %270 {offsets = [0, 32], sizes = [2, 32], strides = [1, 1]} : vector<2x128xf32> to vector<2x32xf32>
    %278 = arith.negf %277 : vector<2x32xf32>
    %279 = math.exp %278 : vector<2x32xf32>
    %cst_73 = arith.constant 1.000000e+00 : f32
    %280 = vector.broadcast %cst_73 : f32 to vector<2x32xf32>
    %281 = arith.addf %280, %279 : vector<2x32xf32>
    %282 = arith.divf %280, %281 : vector<2x32xf32>
    %283 = vector.extract_strided_slice %270 {offsets = [0, 64], sizes = [2, 32], strides = [1, 1]} : vector<2x128xf32> to vector<2x32xf32>
    %284 = math.tanh %283 : vector<2x32xf32>
    %285 = vector.extract_strided_slice %270 {offsets = [0, 96], sizes = [2, 32], strides = [1, 1]} : vector<2x128xf32> to vector<2x32xf32>
    %286 = arith.negf %285 : vector<2x32xf32>
    %287 = math.exp %286 : vector<2x32xf32>
    %cst_74 = arith.constant 1.000000e+00 : f32
    %288 = vector.broadcast %cst_74 : f32 to vector<2x32xf32>
    %289 = arith.addf %288, %287 : vector<2x32xf32>
    %290 = arith.divf %288, %289 : vector<2x32xf32>
    %291 = arith.mulf %282, %267 : vector<2x32xf32>
    %292 = arith.mulf %276, %284 : vector<2x32xf32>
    %293 = arith.addf %291, %292 : vector<2x32xf32>
    %294 = math.tanh %293 : vector<2x32xf32>
    %295 = arith.mulf %290, %294 : vector<2x32xf32>
    %c0_75 = arith.constant 0 : index
    %c0_76 = arith.constant 0 : index
    %c0_77 = arith.constant 0 : index
    %296 = vector.load %arg17[%c0_75, %c0_76, %c0_77] : memref<8x2x32xf32, #tpu.memory_space<vmem>>, vector<1x2x32xf32>
    %297 = vector.shape_cast %296 : vector<1x2x32xf32> to vector<2x32xf32>
    %298 = vector.shape_cast %295 : vector<2x32xf32> to vector<1x2x32xf32>
    tpu.vector_store %arg17[%c0_75, %c0_76, %c0_77], %298 {strides = array<i32>} : memref<8x2x32xf32, #tpu.memory_space<vmem>>, vector<1x2x32xf32>,
    %299 = vector.extract_strided_slice %265 {offsets = [2, 0], sizes = [2, 128], strides = [1, 1]} : vector<16x128xf32> to vector<2x128xf32>
    %cst_78 = arith.constant dense<0.000000e+00> : vector<2x128xf32>
    %300 = tpu.matmul %295, %261, %cst_78 {dimension_numbers = #tpu.dot_dimension_numbers<[1], [0], [0], [1], [0, 0, 1, 1], [], []>} : vector<2x32xf32>, vector<32x128xf32>, vector<2x128xf32> -> vector<2x128xf32>
    %301 = arith.addf %299, %300 : vector<2x128xf32>
    %302 = vector.extract_strided_slice %301 {offsets = [0, 0], sizes = [2, 32], strides = [1, 1]} : vector<2x128xf32> to vector<2x32xf32>
    %303 = arith.negf %302 : vector<2x32xf32>
    %304 = math.exp %303 : vector<2x32xf32>
    %cst_79 = arith.constant 1.000000e+00 : f32
    %305 = vector.broadcast %cst_79 : f32 to vector<2x32xf32>
    %306 = arith.addf %305, %304 : vector<2x32xf32>
    %307 = arith.divf %305, %306 : vector<2x32xf32>
    %308 = vector.extract_strided_slice %301 {offsets = [0, 32], sizes = [2, 32], strides = [1, 1]} : vector<2x128xf32> to vector<2x32xf32>
    %309 = arith.negf %308 : vector<2x32xf32>
    %310 = math.exp %309 : vector<2x32xf32>
    %cst_80 = arith.constant 1.000000e+00 : f32
    %311 = vector.broadcast %cst_80 : f32 to vector<2x32xf32>
    %312 = arith.addf %311, %310 : vector<2x32xf32>
    %313 = arith.divf %311, %312 : vector<2x32xf32>
    %314 = vector.extract_strided_slice %301 {offsets = [0, 64], sizes = [2, 32], strides = [1, 1]} : vector<2x128xf32> to vector<2x32xf32>
    %315 = math.tanh %314 : vector<2x32xf32>
    %316 = vector.extract_strided_slice %301 {offsets = [0, 96], sizes = [2, 32], strides = [1, 1]} : vector<2x128xf32> to vector<2x32xf32>
    %317 = arith.negf %316 : vector<2x32xf32>
    %318 = math.exp %317 : vector<2x32xf32>
    %cst_81 = arith.constant 1.000000e+00 : f32
    %319 = vector.broadcast %cst_81 : f32 to vector<2x32xf32>
    %320 = arith.addf %319, %318 : vector<2x32xf32>
    %321 = arith.divf %319, %320 : vector<2x32xf32>
    %322 = arith.mulf %313, %293 : vector<2x32xf32>
    %323 = arith.mulf %307, %315 : vector<2x32xf32>
    %324 = arith.addf %322, %323 : vector<2x32xf32>
    %325 = math.tanh %324 : vector<2x32xf32>
    %326 = arith.mulf %321, %325 : vector<2x32xf32>
    %c1_82 = arith.constant 1 : index
    %c0_83 = arith.constant 0 : index
    %c0_84 = arith.constant 0 : index
    %327 = vector.load %arg17[%c1_82, %c0_83, %c0_84] : memref<8x2x32xf32, #tpu.memory_space<vmem>>, vector<1x2x32xf32>
    %328 = vector.shape_cast %327 : vector<1x2x32xf32> to vector<2x32xf32>
    %329 = vector.shape_cast %326 : vector<2x32xf32> to vector<1x2x32xf32>
    tpu.vector_store %arg17[%c1_82, %c0_83, %c0_84], %329 {strides = array<i32>} : memref<8x2x32xf32, #tpu.memory_space<vmem>>, vector<1x2x32xf32>,
    %330 = vector.extract_strided_slice %265 {offsets = [4, 0], sizes = [2, 128], strides = [1, 1]} : vector<16x128xf32> to vector<2x128xf32>
    %cst_85 = arith.constant dense<0.000000e+00> : vector<2x128xf32>
    %331 = tpu.matmul %326, %261, %cst_85 {dimension_numbers = #tpu.dot_dimension_numbers<[1], [0], [0], [1], [0, 0, 1, 1], [], []>} : vector<2x32xf32>, vector<32x128xf32>, vector<2x128xf32> -> vector<2x128xf32>
    %332 = arith.addf %330, %331 : vector<2x128xf32>
    %333 = vector.extract_strided_slice %332 {offsets = [0, 0], sizes = [2, 32], strides = [1, 1]} : vector<2x128xf32> to vector<2x32xf32>
    %334 = arith.negf %333 : vector<2x32xf32>
    %335 = math.exp %334 : vector<2x32xf32>
    %cst_86 = arith.constant 1.000000e+00 : f32
    %336 = vector.broadcast %cst_86 : f32 to vector<2x32xf32>
    %337 = arith.addf %336, %335 : vector<2x32xf32>
    %338 = arith.divf %336, %337 : vector<2x32xf32>
    %339 = vector.extract_strided_slice %332 {offsets = [0, 32], sizes = [2, 32], strides = [1, 1]} : vector<2x128xf32> to vector<2x32xf32>
    %340 = arith.negf %339 : vector<2x32xf32>
    %341 = math.exp %340 : vector<2x32xf32>
    %cst_87 = arith.constant 1.000000e+00 : f32
    %342 = vector.broadcast %cst_87 : f32 to vector<2x32xf32>
    %343 = arith.addf %342, %341 : vector<2x32xf32>
    %344 = arith.divf %342, %343 : vector<2x32xf32>
    %345 = vector.extract_strided_slice %332 {offsets = [0, 64], sizes = [2, 32], strides = [1, 1]} : vector<2x128xf32> to vector<2x32xf32>
    %346 = math.tanh %345 : vector<2x32xf32>
    %347 = vector.extract_strided_slice %332 {offsets = [0, 96], sizes = [2, 32], strides = [1, 1]} : vector<2x128xf32> to vector<2x32xf32>
    %348 = arith.negf %347 : vector<2x32xf32>
    %349 = math.exp %348 : vector<2x32xf32>
    %cst_88 = arith.constant 1.000000e+00 : f32
    %350 = vector.broadcast %cst_88 : f32 to vector<2x32xf32>
    %351 = arith.addf %350, %349 : vector<2x32xf32>
    %352 = arith.divf %350, %351 : vector<2x32xf32>
    %353 = arith.mulf %344, %324 : vector<2x32xf32>
    %354 = arith.mulf %338, %346 : vector<2x32xf32>
    %355 = arith.addf %353, %354 : vector<2x32xf32>
    %356 = math.tanh %355 : vector<2x32xf32>
    %357 = arith.mulf %352, %356 : vector<2x32xf32>
    %c2_89 = arith.constant 2 : index
    %c0_90 = arith.constant 0 : index
    %c0_91 = arith.constant 0 : index
    %358 = vector.load %arg17[%c2_89, %c0_90, %c0_91] : memref<8x2x32xf32, #tpu.memory_space<vmem>>, vector<1x2x32xf32>
    %359 = vector.shape_cast %358 : vector<1x2x32xf32> to vector<2x32xf32>
    %360 = vector.shape_cast %357 : vector<2x32xf32> to vector<1x2x32xf32>
    tpu.vector_store %arg17[%c2_89, %c0_90, %c0_91], %360 {strides = array<i32>} : memref<8x2x32xf32, #tpu.memory_space<vmem>>, vector<1x2x32xf32>,
    %361 = vector.extract_strided_slice %265 {offsets = [6, 0], sizes = [2, 128], strides = [1, 1]} : vector<16x128xf32> to vector<2x128xf32>
    %cst_92 = arith.constant dense<0.000000e+00> : vector<2x128xf32>
    %362 = tpu.matmul %357, %261, %cst_92 {dimension_numbers = #tpu.dot_dimension_numbers<[1], [0], [0], [1], [0, 0, 1, 1], [], []>} : vector<2x32xf32>, vector<32x128xf32>, vector<2x128xf32> -> vector<2x128xf32>
    %363 = arith.addf %361, %362 : vector<2x128xf32>
    %364 = vector.extract_strided_slice %363 {offsets = [0, 0], sizes = [2, 32], strides = [1, 1]} : vector<2x128xf32> to vector<2x32xf32>
    %365 = arith.negf %364 : vector<2x32xf32>
    %366 = math.exp %365 : vector<2x32xf32>
    %cst_93 = arith.constant 1.000000e+00 : f32
    %367 = vector.broadcast %cst_93 : f32 to vector<2x32xf32>
    %368 = arith.addf %367, %366 : vector<2x32xf32>
    %369 = arith.divf %367, %368 : vector<2x32xf32>
    %370 = vector.extract_strided_slice %363 {offsets = [0, 32], sizes = [2, 32], strides = [1, 1]} : vector<2x128xf32> to vector<2x32xf32>
    %371 = arith.negf %370 : vector<2x32xf32>
    %372 = math.exp %371 : vector<2x32xf32>
    %cst_94 = arith.constant 1.000000e+00 : f32
    %373 = vector.broadcast %cst_94 : f32 to vector<2x32xf32>
    %374 = arith.addf %373, %372 : vector<2x32xf32>
    %375 = arith.divf %373, %374 : vector<2x32xf32>
    %376 = vector.extract_strided_slice %363 {offsets = [0, 64], sizes = [2, 32], strides = [1, 1]} : vector<2x128xf32> to vector<2x32xf32>
    %377 = math.tanh %376 : vector<2x32xf32>
    %378 = vector.extract_strided_slice %363 {offsets = [0, 96], sizes = [2, 32], strides = [1, 1]} : vector<2x128xf32> to vector<2x32xf32>
    %379 = arith.negf %378 : vector<2x32xf32>
    %380 = math.exp %379 : vector<2x32xf32>
    %cst_95 = arith.constant 1.000000e+00 : f32
    %381 = vector.broadcast %cst_95 : f32 to vector<2x32xf32>
    %382 = arith.addf %381, %380 : vector<2x32xf32>
    %383 = arith.divf %381, %382 : vector<2x32xf32>
    %384 = arith.mulf %375, %355 : vector<2x32xf32>
    %385 = arith.mulf %369, %377 : vector<2x32xf32>
    %386 = arith.addf %384, %385 : vector<2x32xf32>
    %387 = math.tanh %386 : vector<2x32xf32>
    %388 = arith.mulf %383, %387 : vector<2x32xf32>
    %c3_96 = arith.constant 3 : index
    %c0_97 = arith.constant 0 : index
    %c0_98 = arith.constant 0 : index
    %389 = vector.load %arg17[%c3_96, %c0_97, %c0_98] : memref<8x2x32xf32, #tpu.memory_space<vmem>>, vector<1x2x32xf32>
    %390 = vector.shape_cast %389 : vector<1x2x32xf32> to vector<2x32xf32>
    %391 = vector.shape_cast %388 : vector<2x32xf32> to vector<1x2x32xf32>
    tpu.vector_store %arg17[%c3_96, %c0_97, %c0_98], %391 {strides = array<i32>} : memref<8x2x32xf32, #tpu.memory_space<vmem>>, vector<1x2x32xf32>,
    %392 = vector.extract_strided_slice %265 {offsets = [8, 0], sizes = [2, 128], strides = [1, 1]} : vector<16x128xf32> to vector<2x128xf32>
    %cst_99 = arith.constant dense<0.000000e+00> : vector<2x128xf32>
    %393 = tpu.matmul %388, %261, %cst_99 {dimension_numbers = #tpu.dot_dimension_numbers<[1], [0], [0], [1], [0, 0, 1, 1], [], []>} : vector<2x32xf32>, vector<32x128xf32>, vector<2x128xf32> -> vector<2x128xf32>
    %394 = arith.addf %392, %393 : vector<2x128xf32>
    %395 = vector.extract_strided_slice %394 {offsets = [0, 0], sizes = [2, 32], strides = [1, 1]} : vector<2x128xf32> to vector<2x32xf32>
    %396 = arith.negf %395 : vector<2x32xf32>
    %397 = math.exp %396 : vector<2x32xf32>
    %cst_100 = arith.constant 1.000000e+00 : f32
    %398 = vector.broadcast %cst_100 : f32 to vector<2x32xf32>
    %399 = arith.addf %398, %397 : vector<2x32xf32>
    %400 = arith.divf %398, %399 : vector<2x32xf32>
    %401 = vector.extract_strided_slice %394 {offsets = [0, 32], sizes = [2, 32], strides = [1, 1]} : vector<2x128xf32> to vector<2x32xf32>
    %402 = arith.negf %401 : vector<2x32xf32>
    %403 = math.exp %402 : vector<2x32xf32>
    %cst_101 = arith.constant 1.000000e+00 : f32
    %404 = vector.broadcast %cst_101 : f32 to vector<2x32xf32>
    %405 = arith.addf %404, %403 : vector<2x32xf32>
    %406 = arith.divf %404, %405 : vector<2x32xf32>
    %407 = vector.extract_strided_slice %394 {offsets = [0, 64], sizes = [2, 32], strides = [1, 1]} : vector<2x128xf32> to vector<2x32xf32>
    %408 = math.tanh %407 : vector<2x32xf32>
    %409 = vector.extract_strided_slice %394 {offsets = [0, 96], sizes = [2, 32], strides = [1, 1]} : vector<2x128xf32> to vector<2x32xf32>
    %410 = arith.negf %409 : vector<2x32xf32>
    %411 = math.exp %410 : vector<2x32xf32>
    %cst_102 = arith.constant 1.000000e+00 : f32
    %412 = vector.broadcast %cst_102 : f32 to vector<2x32xf32>
    %413 = arith.addf %412, %411 : vector<2x32xf32>
    %414 = arith.divf %412, %413 : vector<2x32xf32>
    %415 = arith.mulf %406, %386 : vector<2x32xf32>
    %416 = arith.mulf %400, %408 : vector<2x32xf32>
    %417 = arith.addf %415, %416 : vector<2x32xf32>
    %418 = math.tanh %417 : vector<2x32xf32>
    %419 = arith.mulf %414, %418 : vector<2x32xf32>
    %c4_103 = arith.constant 4 : index
    %c0_104 = arith.constant 0 : index
    %c0_105 = arith.constant 0 : index
    %420 = vector.load %arg17[%c4_103, %c0_104, %c0_105] : memref<8x2x32xf32, #tpu.memory_space<vmem>>, vector<1x2x32xf32>
    %421 = vector.shape_cast %420 : vector<1x2x32xf32> to vector<2x32xf32>
    %422 = vector.shape_cast %419 : vector<2x32xf32> to vector<1x2x32xf32>
    tpu.vector_store %arg17[%c4_103, %c0_104, %c0_105], %422 {strides = array<i32>} : memref<8x2x32xf32, #tpu.memory_space<vmem>>, vector<1x2x32xf32>,
    %423 = vector.extract_strided_slice %265 {offsets = [10, 0], sizes = [2, 128], strides = [1, 1]} : vector<16x128xf32> to vector<2x128xf32>
    %cst_106 = arith.constant dense<0.000000e+00> : vector<2x128xf32>
    %424 = tpu.matmul %419, %261, %cst_106 {dimension_numbers = #tpu.dot_dimension_numbers<[1], [0], [0], [1], [0, 0, 1, 1], [], []>} : vector<2x32xf32>, vector<32x128xf32>, vector<2x128xf32> -> vector<2x128xf32>
    %425 = arith.addf %423, %424 : vector<2x128xf32>
    %426 = vector.extract_strided_slice %425 {offsets = [0, 0], sizes = [2, 32], strides = [1, 1]} : vector<2x128xf32> to vector<2x32xf32>
    %427 = arith.negf %426 : vector<2x32xf32>
    %428 = math.exp %427 : vector<2x32xf32>
    %cst_107 = arith.constant 1.000000e+00 : f32
    %429 = vector.broadcast %cst_107 : f32 to vector<2x32xf32>
    %430 = arith.addf %429, %428 : vector<2x32xf32>
    %431 = arith.divf %429, %430 : vector<2x32xf32>
    %432 = vector.extract_strided_slice %425 {offsets = [0, 32], sizes = [2, 32], strides = [1, 1]} : vector<2x128xf32> to vector<2x32xf32>
    %433 = arith.negf %432 : vector<2x32xf32>
    %434 = math.exp %433 : vector<2x32xf32>
    %cst_108 = arith.constant 1.000000e+00 : f32
    %435 = vector.broadcast %cst_108 : f32 to vector<2x32xf32>
    %436 = arith.addf %435, %434 : vector<2x32xf32>
    %437 = arith.divf %435, %436 : vector<2x32xf32>
    %438 = vector.extract_strided_slice %425 {offsets = [0, 64], sizes = [2, 32], strides = [1, 1]} : vector<2x128xf32> to vector<2x32xf32>
    %439 = math.tanh %438 : vector<2x32xf32>
    %440 = vector.extract_strided_slice %425 {offsets = [0, 96], sizes = [2, 32], strides = [1, 1]} : vector<2x128xf32> to vector<2x32xf32>
    %441 = arith.negf %440 : vector<2x32xf32>
    %442 = math.exp %441 : vector<2x32xf32>
    %cst_109 = arith.constant 1.000000e+00 : f32
    %443 = vector.broadcast %cst_109 : f32 to vector<2x32xf32>
    %444 = arith.addf %443, %442 : vector<2x32xf32>
    %445 = arith.divf %443, %444 : vector<2x32xf32>
    %446 = arith.mulf %437, %417 : vector<2x32xf32>
    %447 = arith.mulf %431, %439 : vector<2x32xf32>
    %448 = arith.addf %446, %447 : vector<2x32xf32>
    %449 = math.tanh %448 : vector<2x32xf32>
    %450 = arith.mulf %445, %449 : vector<2x32xf32>
    %c5_110 = arith.constant 5 : index
    %c0_111 = arith.constant 0 : index
    %c0_112 = arith.constant 0 : index
    %451 = vector.load %arg17[%c5_110, %c0_111, %c0_112] : memref<8x2x32xf32, #tpu.memory_space<vmem>>, vector<1x2x32xf32>
    %452 = vector.shape_cast %451 : vector<1x2x32xf32> to vector<2x32xf32>
    %453 = vector.shape_cast %450 : vector<2x32xf32> to vector<1x2x32xf32>
    tpu.vector_store %arg17[%c5_110, %c0_111, %c0_112], %453 {strides = array<i32>} : memref<8x2x32xf32, #tpu.memory_space<vmem>>, vector<1x2x32xf32>,
    %454 = vector.extract_strided_slice %265 {offsets = [12, 0], sizes = [2, 128], strides = [1, 1]} : vector<16x128xf32> to vector<2x128xf32>
    %cst_113 = arith.constant dense<0.000000e+00> : vector<2x128xf32>
    %455 = tpu.matmul %450, %261, %cst_113 {dimension_numbers = #tpu.dot_dimension_numbers<[1], [0], [0], [1], [0, 0, 1, 1], [], []>} : vector<2x32xf32>, vector<32x128xf32>, vector<2x128xf32> -> vector<2x128xf32>
    %456 = arith.addf %454, %455 : vector<2x128xf32>
    %457 = vector.extract_strided_slice %456 {offsets = [0, 0], sizes = [2, 32], strides = [1, 1]} : vector<2x128xf32> to vector<2x32xf32>
    %458 = arith.negf %457 : vector<2x32xf32>
    %459 = math.exp %458 : vector<2x32xf32>
    %cst_114 = arith.constant 1.000000e+00 : f32
    %460 = vector.broadcast %cst_114 : f32 to vector<2x32xf32>
    %461 = arith.addf %460, %459 : vector<2x32xf32>
    %462 = arith.divf %460, %461 : vector<2x32xf32>
    %463 = vector.extract_strided_slice %456 {offsets = [0, 32], sizes = [2, 32], strides = [1, 1]} : vector<2x128xf32> to vector<2x32xf32>
    %464 = arith.negf %463 : vector<2x32xf32>
    %465 = math.exp %464 : vector<2x32xf32>
    %cst_115 = arith.constant 1.000000e+00 : f32
    %466 = vector.broadcast %cst_115 : f32 to vector<2x32xf32>
    %467 = arith.addf %466, %465 : vector<2x32xf32>
    %468 = arith.divf %466, %467 : vector<2x32xf32>
    %469 = vector.extract_strided_slice %456 {offsets = [0, 64], sizes = [2, 32], strides = [1, 1]} : vector<2x128xf32> to vector<2x32xf32>
    %470 = math.tanh %469 : vector<2x32xf32>
    %471 = vector.extract_strided_slice %456 {offsets = [0, 96], sizes = [2, 32], strides = [1, 1]} : vector<2x128xf32> to vector<2x32xf32>
    %472 = arith.negf %471 : vector<2x32xf32>
    %473 = math.exp %472 : vector<2x32xf32>
    %cst_116 = arith.constant 1.000000e+00 : f32
    %474 = vector.broadcast %cst_116 : f32 to vector<2x32xf32>
    %475 = arith.addf %474, %473 : vector<2x32xf32>
    %476 = arith.divf %474, %475 : vector<2x32xf32>
    %477 = arith.mulf %468, %448 : vector<2x32xf32>
    %478 = arith.mulf %462, %470 : vector<2x32xf32>
    %479 = arith.addf %477, %478 : vector<2x32xf32>
    %480 = math.tanh %479 : vector<2x32xf32>
    %481 = arith.mulf %476, %480 : vector<2x32xf32>
    %c6_117 = arith.constant 6 : index
    %c0_118 = arith.constant 0 : index
    %c0_119 = arith.constant 0 : index
    %482 = vector.load %arg17[%c6_117, %c0_118, %c0_119] : memref<8x2x32xf32, #tpu.memory_space<vmem>>, vector<1x2x32xf32>
    %483 = vector.shape_cast %482 : vector<1x2x32xf32> to vector<2x32xf32>
    %484 = vector.shape_cast %481 : vector<2x32xf32> to vector<1x2x32xf32>
    tpu.vector_store %arg17[%c6_117, %c0_118, %c0_119], %484 {strides = array<i32>} : memref<8x2x32xf32, #tpu.memory_space<vmem>>, vector<1x2x32xf32>,
    %485 = vector.extract_strided_slice %265 {offsets = [14, 0], sizes = [2, 128], strides = [1, 1]} : vector<16x128xf32> to vector<2x128xf32>
    %cst_120 = arith.constant dense<0.000000e+00> : vector<2x128xf32>
    %486 = tpu.matmul %481, %261, %cst_120 {dimension_numbers = #tpu.dot_dimension_numbers<[1], [0], [0], [1], [0, 0, 1, 1], [], []>} : vector<2x32xf32>, vector<32x128xf32>, vector<2x128xf32> -> vector<2x128xf32>
    %487 = arith.addf %485, %486 : vector<2x128xf32>
    %488 = vector.extract_strided_slice %487 {offsets = [0, 0], sizes = [2, 32], strides = [1, 1]} : vector<2x128xf32> to vector<2x32xf32>
    %489 = arith.negf %488 : vector<2x32xf32>
    %490 = math.exp %489 : vector<2x32xf32>
    %cst_121 = arith.constant 1.000000e+00 : f32
    %491 = vector.broadcast %cst_121 : f32 to vector<2x32xf32>
    %492 = arith.addf %491, %490 : vector<2x32xf32>
    %493 = arith.divf %491, %492 : vector<2x32xf32>
    %494 = vector.extract_strided_slice %487 {offsets = [0, 32], sizes = [2, 32], strides = [1, 1]} : vector<2x128xf32> to vector<2x32xf32>
    %495 = arith.negf %494 : vector<2x32xf32>
    %496 = math.exp %495 : vector<2x32xf32>
    %cst_122 = arith.constant 1.000000e+00 : f32
    %497 = vector.broadcast %cst_122 : f32 to vector<2x32xf32>
    %498 = arith.addf %497, %496 : vector<2x32xf32>
    %499 = arith.divf %497, %498 : vector<2x32xf32>
    %500 = vector.extract_strided_slice %487 {offsets = [0, 64], sizes = [2, 32], strides = [1, 1]} : vector<2x128xf32> to vector<2x32xf32>
    %501 = math.tanh %500 : vector<2x32xf32>
    %502 = vector.extract_strided_slice %487 {offsets = [0, 96], sizes = [2, 32], strides = [1, 1]} : vector<2x128xf32> to vector<2x32xf32>
    %503 = arith.negf %502 : vector<2x32xf32>
    %504 = math.exp %503 : vector<2x32xf32>
    %cst_123 = arith.constant 1.000000e+00 : f32
    %505 = vector.broadcast %cst_123 : f32 to vector<2x32xf32>
    %506 = arith.addf %505, %504 : vector<2x32xf32>
    %507 = arith.divf %505, %506 : vector<2x32xf32>
    %508 = arith.mulf %499, %479 : vector<2x32xf32>
    %509 = arith.mulf %493, %501 : vector<2x32xf32>
    %510 = arith.addf %508, %509 : vector<2x32xf32>
    %511 = math.tanh %510 : vector<2x32xf32>
    %512 = arith.mulf %507, %511 : vector<2x32xf32>
    %c7_124 = arith.constant 7 : index
    %c0_125 = arith.constant 0 : index
    %c0_126 = arith.constant 0 : index
    %513 = vector.load %arg17[%c7_124, %c0_125, %c0_126] : memref<8x2x32xf32, #tpu.memory_space<vmem>>, vector<1x2x32xf32>
    %514 = vector.shape_cast %513 : vector<1x2x32xf32> to vector<2x32xf32>
    %515 = vector.shape_cast %512 : vector<2x32xf32> to vector<1x2x32xf32>
    tpu.vector_store %arg17[%c7_124, %c0_125, %c0_126], %515 {strides = array<i32>} : memref<8x2x32xf32, #tpu.memory_space<vmem>>, vector<1x2x32xf32>,
    %c0_127 = arith.constant 0 : index
    %c0_128 = arith.constant 0 : index
    %c0_129 = arith.constant 0 : index
    %516 = vector.load %arg17[%c0_127, %c0_128, %c0_129] : memref<8x2x32xf32, #tpu.memory_space<vmem>>, vector<8x2x32xf32>
    %517 = vector.shape_cast %516 : vector<8x2x32xf32> to vector<16x32xf32>
    %c0_130 = arith.constant 0 : index
    %c0_131 = arith.constant 0 : index
    %518 = vector.load %arg7[%c0_130, %c0_131] : memref<4x8xf32, #tpu.memory_space<vmem>>, vector<4x8xf32>
    %cst_132 = arith.constant dense<0.000000e+00> : vector<16x8xf32>
    %519 = tpu.matmul %1, %518, %cst_132 {dimension_numbers = #tpu.dot_dimension_numbers<[1], [0], [0], [1], [0, 0, 1, 1], [], []>} : vector<16x4xf32>, vector<4x8xf32>, vector<16x8xf32> -> vector<16x8xf32>
    %c0_133 = arith.constant 0 : index
    %c0_134 = arith.constant 0 : index
    %520 = vector.load %arg8[%c0_133, %c0_134] : memref<32x8xf32, #tpu.memory_space<vmem>>, vector<32x8xf32>
    %cst_135 = arith.constant dense<0.000000e+00> : vector<16x8xf32>
    %521 = tpu.matmul %517, %520, %cst_135 {dimension_numbers = #tpu.dot_dimension_numbers<[1], [0], [0], [1], [0, 0, 1, 1], [], []>} : vector<16x32xf32>, vector<32x8xf32>, vector<16x8xf32> -> vector<16x8xf32>
    %522 = arith.addf %519, %521 : vector<16x8xf32>
    %c0_136 = arith.constant 0 : index
    %c0_137 = arith.constant 0 : index
    %523 = vector.load %arg9[%c0_136, %c0_137] : memref<1x8xf32, #tpu.memory_space<vmem>>, vector<1x8xf32>
    %524 = vector.broadcast %523 : vector<1x8xf32> to vector<16x8xf32>
    %525 = arith.addf %522, %524 : vector<16x8xf32>
    %cst_138 = arith.constant dense<0xFF800000> : vector<16xf32>
    %526 = vector.multi_reduction <maximumf>, %525, %cst_138 [1] : vector<16x8xf32> to vector<16xf32>
    %527 = vector.shape_cast %526 : vector<16xf32> to vector<16x1xf32>
    %528 = vector.broadcast %527 : vector<16x1xf32> to vector<16x8xf32>
    %529 = arith.subf %525, %528 : vector<16x8xf32>
    %530 = math.exp %529 : vector<16x8xf32>
    %cst_139 = arith.constant dense<0.000000e+00> : vector<16xf32>
    %531 = vector.multi_reduction <add>, %530, %cst_139 [1] : vector<16x8xf32> to vector<16xf32>
    %532 = vector.shape_cast %531 : vector<16xf32> to vector<16x1xf32>
    %533 = vector.broadcast %532 : vector<16x1xf32> to vector<16x8xf32>
    %534 = arith.divf %530, %533 : vector<16x8xf32>
    %535 = vector.shape_cast %534 : vector<16x8xf32> to vector<8x2x8xf32>
    %536 = vector.extract_strided_slice %535 {offsets = [0, 0, 0], sizes = [8, 1, 8], strides = [1, 1, 1]} : vector<8x2x8xf32> to vector<8x1x8xf32>
    %537 = vector.shape_cast %536 : vector<8x1x8xf32> to vector<8x8xf32>
    %538 = vector.extract_strided_slice %516 {offsets = [0, 0, 0], sizes = [8, 1, 32], strides = [1, 1, 1]} : vector<8x2x32xf32> to vector<8x1x32xf32>
    %539 = vector.shape_cast %538 : vector<8x1x32xf32> to vector<8x32xf32>
    %cst_140 = arith.constant dense<0.000000e+00> : vector<8x32xf32>
    %540 = tpu.matmul %537, %539, %cst_140 {dimension_numbers = #tpu.dot_dimension_numbers<[1], [0], [0], [1], [0, 0, 1, 1], [], []>} : vector<8x8xf32>, vector<8x32xf32>, vector<8x32xf32> -> vector<8x32xf32>
    %541 = vector.extract_strided_slice %535 {offsets = [0, 1, 0], sizes = [8, 1, 8], strides = [1, 1, 1]} : vector<8x2x8xf32> to vector<8x1x8xf32>
    %542 = vector.shape_cast %541 : vector<8x1x8xf32> to vector<8x8xf32>
    %543 = vector.extract_strided_slice %516 {offsets = [0, 1, 0], sizes = [8, 1, 32], strides = [1, 1, 1]} : vector<8x2x32xf32> to vector<8x1x32xf32>
    %544 = vector.shape_cast %543 : vector<8x1x32xf32> to vector<8x32xf32>
    %cst_141 = arith.constant dense<0.000000e+00> : vector<8x32xf32>
    %545 = tpu.matmul %542, %544, %cst_141 {dimension_numbers = #tpu.dot_dimension_numbers<[1], [0], [0], [1], [0, 0, 1, 1], [], []>} : vector<8x8xf32>, vector<8x32xf32>, vector<8x32xf32> -> vector<8x32xf32>
    %546 = vector.shape_cast %540 : vector<8x32xf32> to vector<8x1x32xf32>
    %547 = vector.shape_cast %545 : vector<8x32xf32> to vector<8x1x32xf32>
    %548 = tpu.concatenate %546, %547 in 1 : vector<8x1x32xf32>, vector<8x1x32xf32> -> vector<8x2x32xf32>
    %549 = vector.shape_cast %548 : vector<8x2x32xf32> to vector<16x32xf32>
    %c0_142 = arith.constant 0 : index
    %c0_143 = arith.constant 0 : index
    %550 = vector.load %arg10[%c0_142, %c0_143] : memref<4x32xf32, #tpu.memory_space<vmem>>, vector<4x32xf32>
    %cst_144 = arith.constant dense<0.000000e+00> : vector<16x32xf32>
    %551 = tpu.matmul %1, %550, %cst_144 {dimension_numbers = #tpu.dot_dimension_numbers<[1], [0], [0], [1], [0, 0, 1, 1], [], []>} : vector<16x4xf32>, vector<4x32xf32>, vector<16x32xf32> -> vector<16x32xf32>
    %c0_145 = arith.constant 0 : index
    %c0_146 = arith.constant 0 : index
    %552 = vector.load %arg11[%c0_145, %c0_146] : memref<32x32xf32, #tpu.memory_space<vmem>>, vector<32x32xf32>
    %cst_147 = arith.constant dense<0.000000e+00> : vector<16x32xf32>
    %553 = tpu.matmul %549, %552, %cst_147 {dimension_numbers = #tpu.dot_dimension_numbers<[1], [0], [0], [1], [0, 0, 1, 1], [], []>} : vector<16x32xf32>, vector<32x32xf32>, vector<16x32xf32> -> vector<16x32xf32>
    %554 = arith.addf %551, %553 : vector<16x32xf32>
    %c0_148 = arith.constant 0 : index
    %c0_149 = arith.constant 0 : index
    %555 = vector.load %arg12[%c0_148, %c0_149] : memref<1x32xf32, #tpu.memory_space<vmem>>, vector<1x32xf32>
    %556 = vector.broadcast %555 : vector<1x32xf32> to vector<16x32xf32>
    %557 = arith.addf %554, %556 : vector<16x32xf32>
    %cst_150 = arith.constant 0.000000e+00 : f32
    %558 = vector.broadcast %cst_150 : f32 to vector<16x32xf32>
    %559 = arith.maximumf %557, %558 : vector<16x32xf32>
    %c0_151 = arith.constant 0 : index
    %c0_152 = arith.constant 0 : index
    %560 = vector.load %arg13[%c0_151, %c0_152] : memref<32x10xf32, #tpu.memory_space<vmem>>, vector<32x10xf32>
    %cst_153 = arith.constant dense<0.000000e+00> : vector<16x10xf32>
    %561 = tpu.matmul %559, %560, %cst_153 {dimension_numbers = #tpu.dot_dimension_numbers<[1], [0], [0], [1], [0, 0, 1, 1], [], []>} : vector<16x32xf32>, vector<32x10xf32>, vector<16x10xf32> -> vector<16x10xf32>
    %c0_154 = arith.constant 0 : index
    %c0_155 = arith.constant 0 : index
    %562 = vector.load %arg14[%c0_154, %c0_155] : memref<1x10xf32, #tpu.memory_space<vmem>>, vector<1x10xf32>
    %563 = vector.broadcast %562 : vector<1x10xf32> to vector<16x10xf32>
    %564 = arith.addf %561, %563 : vector<16x10xf32>
    %565 = vector.shape_cast %564 : vector<16x10xf32> to vector<8x2x10xf32>
    %c0_156 = arith.constant 0 : index
    %c0_157 = arith.constant 0 : index
    %c0_158 = arith.constant 0 : index
    %566 = vector.load %arg15[%c0_156, %c0_157, %c0_158] : memref<8x2x10xf32, #tpu.memory_space<vmem>>, vector<8x2x10xf32>
    tpu.vector_store %arg15[%c0_156, %c0_157, %c0_158], %565 {strides = array<i32>} : memref<8x2x10xf32, #tpu.memory_space<vmem>>, vector<8x2x10xf32>,
    %c0_159 = arith.constant 0 : index
    %c0_160 = arith.constant 0 : index
    %c0_161 = arith.constant 0 : index
    %567 = vector.load %arg16[%c0_159, %c0_160, %c0_161] : memref<8x2x8xf32, #tpu.memory_space<vmem>>, vector<8x2x8xf32>
    tpu.vector_store %arg16[%c0_159, %c0_160, %c0_161], %535 {strides = array<i32>} : memref<8x2x8xf32, #tpu.memory_space<vmem>>, vector<8x2x8xf32>,
    return
  }
}

</mosaic_0001>

<bundles_post_ra>
// kernel: tpu_custom_call.1
= control target key start
LH: loop header
LB: loop body
LE: loop exit
PB: predicated region body
PF: predicated region fallthrough
CT: control target
= control target key end

     0   :  { %s2817_s0 = inlined_call_operand.vmem [shape: f32[8,2,4], index: 0, kind: input, shape index: {}]   ;;  %s2818_s1 = inlined_call_operand.vmem [shape: f32[4,128], index: 1, kind: input, shape index: {}]   ;;  %s2819_s2 = inlined_call_operand.vmem [shape: f32[32,128], index: 2, kind: input, shape index: {}]   ;;  %s2820_s3 = inlined_call_operand.vmem [shape: f32[1,128], index: 3, kind: input, shape index: {}]   ;;  %s2821_s4 = inlined_call_operand.vmem [shape: f32[32,128], index: 4, kind: input, shape index: {}]   ;;  %s2822_s5 = inlined_call_operand.hbm [shape: f32[32,128], index: 5, kind: input, shape index: {}]   ;;  %s2823_s6 = inlined_call_operand.vmem [shape: f32[1,128], index: 6, kind: input, shape index: {}]   ;;  %s2824_s7 = inlined_call_operand.vmem [shape: f32[4,8], index: 7, kind: input, shape index: {}]   ;;  %s2825_s8 = inlined_call_operand.vmem [shape: f32[32,8], index: 8, kind: input, shape index: {}]   ;;  %s2826_s9 = inlined_call_operand.vmem [shape: f32[1,8], index: 9, kind: input, shape index: {}]   ;;  %s2827_s10 = inlined_call_operand.vmem [shape: f32[4,32], index: 10, kind: input, shape index: {}]   ;;  %s2828_s11 = inlined_call_operand.hbm [shape: f32[32,32], index: 11, kind: input, shape index: {}]   ;;  %s2829_s12 = inlined_call_operand.vmem [shape: f32[1,32], index: 12, kind: input, shape index: {}]   ;;  %s2830_s13 = inlined_call_operand.vmem [shape: f32[32,10], index: 13, kind: input, shape index: {}]   ;;  %s2831_s14 = inlined_call_operand.vmem [shape: f32[1,10], index: 14, kind: input, shape index: {}]   ;;  %s2832_s15 = inlined_call_operand.hbm [shape: f32[8,2,10], index: 15, kind: output, shape index: {0}]   ;;  %s2833_s16 = inlined_call_operand.hbm [shape: f32[8,2,8], index: 16, kind: output, shape index: {1}]  }
   0x1   :  { %2835 = sst [smem:[#allocation15_spill]] %s2817_s0 }
   0x2   :  { %22 = vsyncpa [#allocation4], 0 }
   0x3   :  { %23 = vsyncpa [#allocation7], 0 }
   0x4   :  { %24 = vsyncpa [#allocation5], 0 }
   0x5   :  { %25 = vsyncpa [#allocation10], 0  ;;  %s40_s23 = sshll.u32 %s2822_s5, 4  ;;  %s2255_s24 = smov [#allocation3]   ;;  %s41_s23 = int_to_ptr.hbm [resolvable:$true] %s40_s23 }
   0x6   :  { %s42_s25 = sshll.u32 %s2255_s24, 4  ;;  %s63_s28 = sshll.u32 %s2828_s11, 4  ;;  %s43_s25 = int_to_ptr.vmem [resolvable:$true] %s42_s25  ;;  %s64_s28 = int_to_ptr.hbm [resolvable:$true] %s63_s28 }
   0x7   :  { %s2256_s29 = smov 128   ;;  %s2257_s30 = smov 8  }
   0x8   :  { %48 = dma.hbm_to_vmem [thread:$0]  %s41_s23, 512, %s43_s25, [#allocation4], %s2256_s29, %s2256_s29, %s2257_s30  }
   0x9   :  { %s2258_s0 = smov [#allocation6]  }
   0xa   :  { %s65_s17 = sshll.u32 %s2258_s0, 4  ;;  %s66_s17 = int_to_ptr.vmem [resolvable:$true] %s65_s17 }
   0xb   :  { %71 = dma.hbm_to_vmem [thread:$0]  %s64_s28, 512, %s66_s17, [#allocation7], %s2256_s29, %s2256_s29, %s2257_s30  }
   0xc   :  { %2247 = dma.done.wait [#allocation4], 512  }
   0xd   :  { %2248 = vsyncadd [#allocation4], 4294966784 }
   0xe   :  { %2249 = dma.done.wait [#allocation7], 512  }
   0xf   :  { %2250 = vsyncadd [#allocation7], 4294966784  ;;  %vm133_vm0 = vcmask 1043456   ;;  %v94_v0 = vld [vmem:[%s2818_s1] sm:$0xf]  ;;  %s2836_s11 = sld [smem:[#allocation15_spill]] }
  0x10   :  { %1999 = vmatpush.msk.msra.mxu1 %vm133_vm0, %v94_v0  ;;  %1950 = vmatpush.msk.msra.mxu0 %vm133_vm0, %v94_v0  ;;  %v98_v5 = vld [vmem:[%s2819_s2 + $0x18] sm:$0xff]  ;;  %v97_v6 = vld [vmem:[%s2819_s2 + $0x10] sm:$0xff]  ;;  %v96_v9 = vld [vmem:[%s2819_s2 + $0x8] sm:$0xff]  ;;  %vm128_vm1 = vcmask 31744   ;;  %v2259_v15 = vmov 0.0   ;;  %s2260_s26 = smov 64  }
  0x11   :  { %242 = vmatpush.msra.mxu2 %v98_v5  ;;  %318 = vmatpush.msra.mxu3 %v98_v5  ;;  %v95_v12 = vld [vmem:[%s2819_s2] sm:$0xff]  ;;  %vm226_vm6 = vcmask 254976   ;;  %vm160_vm7 = vcmask 261120   ;;  %s2263_s20 = smov 2   ;;  %s1918_s25 = sshll.u32 %s2832_s15, 4  ;;  %s1919_s25 = int_to_ptr.hbm [resolvable:$true] %s1918_s25 }
  0x12   :  { %176 = vmatpush.msrb.mxu1 %v98_v5  ;;  %614 = vmatpush.msrb.mxu0 %v98_v5  ;;  %v2010_v16 = vld [vmem:[%s2820_s3] ss:$0 sm:$0xff]  ;;  %s2261_s3 = smov 32  }
  0x13   :  { %243 = vmatpush.msra.mxu2 %v97_v6  ;;  %319 = vmatpush.msra.mxu3 %v97_v6 }
  0x14   :  { %177 = vmatpush.msrb.mxu1 %v97_v6  ;;  %615 = vmatpush.msrb.mxu0 %v97_v6 }
  0x15   :  { %v2362_v1 = vld [vmem:[%s2836_s11 + $0x8] sm:$0x3]  ;;  %v2367_v2 = vld [vmem:[%s2836_s11 + $0xa] sm:$0x3]  ;;  %v2373_v3 = vld [vmem:[%s2836_s11 + $0xc] sm:$0x3]  ;;  %244 = vmatpush.msra.mxu2 %v96_v9  ;;  %320 = vmatpush.msra.mxu3 %v96_v9 }
  0x16   :  { %v2378_v4 = vld [vmem:[%s2836_s11 + $0xe] sm:$0x3]  ;;  %119 = vst [vmem:[#allocation1 + $0x20] ss:$4 sm:$0xff] %v2362_v1  ;;  %v2393_v7 = vld [vmem:[%s2836_s11] sm:$0x3]  ;;  %178 = vmatpush.msrb.mxu1 %v96_v9  ;;  %616 = vmatpush.msrb.mxu0 %v96_v9 }
  0x17   :  { %121 = vst [vmem:[#allocation1 + $0x21] ss:$4 sm:$0xff] %v2367_v2  ;;  %v2398_v8 = vld [vmem:[%s2836_s11 + $0x2] sm:$0x3]  ;;  %v2407_v10 = vld [vmem:[%s2836_s11 + $0x4] sm:$0x3]  ;;  %245 = vmatpush.msra.mxu2 %v95_v12  ;;  %321 = vmatpush.msra.mxu3 %v95_v12 }
  0x18   :  { %123 = vst [vmem:[#allocation1 + $0x22] ss:$4 sm:$0xff] %v2373_v3  ;;  %v2412_v11 = vld [vmem:[%s2836_s11 + $0x6] sm:$0x3]  ;;  %179 = vmatpush.msrb.mxu1 %v95_v12  ;;  %617 = vmatpush.msrb.mxu0 %v95_v12 }
  0x19   :  { %125 = vst [vmem:[#allocation1 + $0x23] ss:$4 sm:$0xff] %v2378_v4  ;;  %470 = vmatpush.msrb.mxu2 %v98_v5  ;;  %539 = vmatpush.msrb.mxu3 %v98_v5 }
  0x1a   :  { %111 = vst [vmem:[#allocation1] ss:$4 sm:$0xff] %v2393_v7 }
  0x1b   :  { %113 = vst [vmem:[#allocation1 + $0x1] ss:$4 sm:$0xff] %v2398_v8  ;;  %471 = vmatpush.msrb.mxu2 %v97_v6  ;;  %540 = vmatpush.msrb.mxu3 %v97_v6 }
  0x1c   :  { %115 = vst [vmem:[#allocation1 + $0x2] ss:$4 sm:$0xff] %v2407_v10 }
  0x1d   :  { %117 = vst [vmem:[#allocation1 + $0x3] ss:$4 sm:$0xff] %v2412_v11  ;;  %472 = vmatpush.msrb.mxu2 %v96_v9  ;;  %541 = vmatpush.msrb.mxu3 %v96_v9 }
  0x1f   :  { %473 = vmatpush.msrb.mxu2 %v95_v12  ;;  %542 = vmatpush.msrb.mxu3 %v95_v12 }
  0x20   :  { %v127_v13 = vld.sshfl [vmem:[#allocation1 + $0x20] sm:$0xff pattern:$0x73625140] }
  0x21   :  { %1952 = vmatmul.msk.f32.vlgmr.msra.gmra.mxu1 %vm128_vm1, %v127_v13 }
  0x22   :  { %394 = vmatpush.msra.mxu1 %v98_v5 }
  0x24   :  { %v126_v14 = vld.sshfl [vmem:[#allocation1] sm:$0xff pattern:$0x73625140]  ;;  %395 = vmatpush.msra.mxu1 %v97_v6 }
  0x25   :  { %1951 = vmatmul.msk.f32.vlgmr.msra.gmra.mxu0 %vm128_vm1, %v126_v14 }
  0x26   :  { %396 = vmatpush.msra.mxu1 %v96_v9 }
  0x28   :  { %397 = vmatpush.msra.mxu1 %v95_v12 }
  0x29   :  { %180 = vmatmul.f32.vlgmr.msrb.gmra.mxu1 %v2259_v15 }
  0x2a   :  { %689 = vmatpush.msrb.mxu1 %v98_v5 }
  0x2c   :  { %690 = vmatpush.msrb.mxu1 %v97_v6 }
  0x2e   :  { %691 = vmatpush.msrb.mxu1 %v96_v9 }
  0x30   :  { %692 = vmatpush.msrb.mxu1 %v95_v12 }
  0x9e   :  { %v157_v17 = vpop.f32.mrf.mxu1 }
  0x9f   :  { %v2427_v18 = vadd.f32 %v2010_v16, %v157_v17 }
  0xa2   :  { %v154_v19 = vpop.f32.mrf.mxu0 }
  0xa3   :  { %v2429_v20 = vadd.f32 %v2010_v16, %v154_v19 }
  0xa6   :  { %v181_v21 = vpop.f32.mrf.mxu1 }
  0xa7   :  { %v184_v22 = vadd.f32 %v181_v21, %v2429_v20 }
  0xa9   :  { %2015 = vtanh.f32 %v184_v22  ;;  %v1953_v24 = vmul.f32 -1.442695, %v184_v22 }
  0xab   :  { %2017 = vpow2.f32 %v1953_v24 }
  0xaf   :  { %v2016_v23 = vpop.eup %2015 }
  0xb0   :  { %207 = vrot.lane.b32.xlu0 %v2016_v23, %s2260_s26 }
  0xb1   :  { %v2018_v25 = vpop.eup %2017 }
  0xb2   :  { %v188_v26 = vadd.f32 1.0, %v2018_v25 }
  0xb4   :  { %2019 = vrcp.f32 %v188_v26  ;;  %v200_v32 = vand.u32 2147483648, %v188_v26  ;;  %vm194_vm3 = vweird.f32 %v188_v26  ;;  %v198_v33 = vand.u32 2147483647, %v188_v26 }
  0xb6   :  { %v201_v35 = vor.u32 1.1754944e-38, %v200_v32  ;;  %vm199_vm5 = vcmp.eq.f32.partialorder %v198_v33, 8.507059e+37 }
  0xba   :  { %v2020_v27 = vpop.eup %2019 }
  0xbb   :  { %v190_v28 = vmul.f32 %v2020_v27, %v188_v26  ;;  %vm195_vm2 = vweird.f32 %v2020_v27 }
  0xbc   :  { %vm196_vm4 = vmor %vm194_vm3, %vm195_vm2 }
  0xbd   :  { %v191_v29 = vsub.f32 1.0, %v190_v28 }
  0xbf   :  { %v192_v30 = vmul.f32 %v2020_v27, %v191_v29 }
  0xc1   :  { %v193_v31 = vadd.f32 %v2020_v27, %v192_v30 }
  0xc3   :  { %v197_v34 = vsel %vm196_vm4, %v2020_v27, %v193_v31 }
  0xc4   :  { %v202_v37 = vsel %vm199_vm5, %v201_v35, %v197_v34 }
  0xc5   :  { %v205_v39 = vmul.f32 0.0, %v202_v37 }
 0x122   :  { %v208_v36 = vpop.permute.xlu0 %207 }
 0x123   :  { %v210_v38 = vmul.f32 %v208_v36, %v202_v37 }
 0x125   :  { %212 = vrot.lane.b32.xlu0 %v210_v38, %s2261_s3 }
 0x197   :  { %v213_v40 = vpop.permute.xlu0 %212 }
 0x198   :  { %v215_v41 = vadd.f32 %v213_v40, %v205_v39 }
 0x19a   :  { %2021 = vtanh.f32 %v215_v41  ;;  %v275_v6 = vrot.slane %v215_v41, 6 }
 0x1a0   :  { %v2022_v42 = vpop.eup %2021 }
 0x1a1   :  { %218 = vrot.lane.b32.xlu1 %v2022_v42, %s2260_s26 }
 0x213   :  { %v219_v43 = vpop.permute.xlu1 %218 }
 0x214   :  { %v221_v44 = vmul.f32 %v219_v43, %v202_v37 }
 0x216   :  { %223 = vrot.lane.b32.xlu1 %v221_v44, %s2261_s3 }
 0x288   :  { %v224_v45 = vpop.permute.xlu1 %223 }
 0x289   :  { %227 = vst.msk [vmem:[#allocation2] sm:$0x3] %vm226_vm6, %v224_v45  ;;  %1954 = vmatmul.msk.f32.vlgmr.msra.gmra.mxu2 %vm160_vm7, %v224_v45 }
 0x290   :  { %v747_v46 = vld [vmem:[#allocation2] sm:$0x3] }
 0x291   :  { %775 = vst [vmem:[#allocation1] ss:$4 sm:$0xff] %v747_v46 }
 0x30c   :  { %v247_v47 = vpop.f32.mrf.mxu2 }
 0x30d   :  { %v251_v48 = vrot.slane %v247_v47, 6 }
 0x30f   :  { %v253_v49 = vadd.f32 %v251_v48, %v2429_v20 }
 0x311   :  { %2023 = vtanh.f32 %v253_v49  ;;  %v1955_v51 = vmul.f32 -1.442695, %v253_v49 }
 0x313   :  { %2025 = vpow2.f32 %v1955_v51 }
 0x317   :  { %v2024_v50 = vpop.eup %2023 }
 0x318   :  { %279 = vrot.lane.b32.xlu2 %v2024_v50, %s2260_s26 }
 0x319   :  { %v2026_v52 = vpop.eup %2025 }
 0x31a   :  { %v257_v53 = vadd.f32 1.0, %v2026_v52 }
 0x31c   :  { %2027 = vrcp.f32 %v257_v53  ;;  %v269_v59 = vand.u32 2147483648, %v257_v53  ;;  %vm263_vm9 = vweird.f32 %v257_v53  ;;  %v267_v60 = vand.u32 2147483647, %v257_v53 }
 0x31e   :  { %v270_v62 = vor.u32 1.1754944e-38, %v269_v59  ;;  %vm268_vm11 = vcmp.eq.f32.partialorder %v267_v60, 8.507059e+37 }
 0x322   :  { %v2028_v54 = vpop.eup %2027 }
 0x323   :  { %v259_v55 = vmul.f32 %v2028_v54, %v257_v53  ;;  %vm264_vm8 = vweird.f32 %v2028_v54 }
 0x324   :  { %vm265_vm10 = vmor %vm263_vm9, %vm264_vm8 }
 0x325   :  { %v260_v56 = vsub.f32 1.0, %v259_v55 }
 0x327   :  { %v261_v57 = vmul.f32 %v2028_v54, %v260_v56 }
 0x329   :  { %v262_v58 = vadd.f32 %v2028_v54, %v261_v57 }
 0x32b   :  { %v266_v61 = vsel %vm265_vm10, %v2028_v54, %v262_v58 }
 0x32c   :  { %v271_v0 = vsel %vm268_vm11, %v270_v62, %v266_v61 }
 0x32d   :  { %v277_v9 = vmul.f32 %v275_v6, %v271_v0 }
 0x372   :  { %v280_v63 = vpop.permute.xlu2 %279 }
 0x373   :  { %v282_v5 = vmul.f32 %v280_v63, %v271_v0 }
 0x375   :  { %284 = vrot.lane.b32.xlu2 %v282_v5, %s2261_s3 }
 0x3cf   :  { %v285_v12 = vpop.permute.xlu2 %284 }
 0x3d0   :  { %v287_v13 = vadd.f32 %v285_v12, %v277_v9 }
 0x3d2   :  { %2029 = vtanh.f32 %v287_v13  ;;  %v351_v41 = vrot.slane %v287_v13, 6 }
 0x3d8   :  { %v2030_v14 = vpop.eup %2029 }
 0x3d9   :  { %290 = vrot.lane.b32.xlu0 %v2030_v14, %s2260_s26 }
 0x44b   :  { %v291_v16 = vpop.permute.xlu0 %290 }
 0x44c   :  { %v2442_v17 = vmul.f32 %v291_v16, %v271_v0 }
 0x44e   :  { %v301_v19 = vrot.slane %v2442_v17, 2 }
 0x450   :  { %302 = vrot.lane.b32.xlu1 %v301_v19, %s2261_s3 }
 0x4c2   :  { %v303_v21 = vpop.permute.xlu1 %302 }
 0x4c3   :  { %1956 = vmatmul.msk.f32.vlgmr.msra.gmra.mxu3 %vm160_vm7, %v303_v21 }
 0x546   :  { %v323_v22 = vpop.f32.mrf.mxu3 }
 0x547   :  { %v327_v23 = vrot.slane %v323_v22, 4 }
 0x549   :  { %v329_v24 = vadd.f32 %v327_v23, %v2429_v20 }
 0x54b   :  { %2031 = vtanh.f32 %v329_v24  ;;  %v1957_v26 = vmul.f32 -1.442695, %v329_v24 }
 0x54d   :  { %2033 = vpow2.f32 %v1957_v26 }
 0x551   :  { %v2032_v25 = vpop.eup %2031 }
 0x552   :  { %355 = vrot.lane.b32.xlu2 %v2032_v25, %s2260_s26 }
 0x553   :  { %v2034_v27 = vpop.eup %2033 }
 0x554   :  { %v333_v28 = vadd.f32 1.0, %v2034_v27 }
 0x556   :  { %2035 = vrcp.f32 %v333_v28  ;;  %v345_v34 = vand.u32 2147483648, %v333_v28  ;;  %vm339_vm13 = vweird.f32 %v333_v28  ;;  %v343_v35 = vand.u32 2147483647, %v333_v28 }
 0x558   :  { %v346_v37 = vor.u32 1.1754944e-38, %v345_v34  ;;  %vm344_vm15 = vcmp.eq.f32.partialorder %v343_v35, 8.507059e+37 }
 0x55c   :  { %v2036_v29 = vpop.eup %2035 }
 0x55d   :  { %v335_v30 = vmul.f32 %v2036_v29, %v333_v28  ;;  %vm340_vm12 = vweird.f32 %v2036_v29 }
 0x55e   :  { %vm341_vm14 = vmor %vm339_vm13, %vm340_vm12  ;;  %vm299_vm12 = vcmask 257026   ;;  %vm375_vm13 = vcmask 259076  }
 0x55f   :  { %v336_v31 = vsub.f32 1.0, %v335_v30 }
 0x561   :  { %v337_v32 = vmul.f32 %v2036_v29, %v336_v31 }
 0x563   :  { %v338_v33 = vadd.f32 %v2036_v29, %v337_v32 }
 0x565   :  { %v342_v36 = vsel %vm341_vm14, %v2036_v29, %v338_v33  ;;  %vm451_vm14 = vcmask 261126  }
 0x566   :  { %v347_v39 = vsel %vm344_vm15, %v346_v37, %v342_v36 }
 0x567   :  { %v353_v42 = vmul.f32 %v351_v41, %v347_v39 }
 0x5ac   :  { %v356_v38 = vpop.permute.xlu2 %355 }
 0x5ad   :  { %v358_v40 = vmul.f32 %v356_v38, %v347_v39 }
 0x5af   :  { %360 = vrot.lane.b32.xlu0 %v358_v40, %s2261_s3 }
 0x621   :  { %v361_v43 = vpop.permute.xlu0 %360 }
 0x622   :  { %v363_v44 = vadd.f32 %v361_v43, %v353_v42 }
 0x624   :  { %2037 = vtanh.f32 %v363_v44  ;;  %v427_v12 = vrot.slane %v363_v44, 6 }
 0x62a   :  { %v2038_v45 = vpop.eup %2037 }
 0x62b   :  { %366 = vrot.lane.b32.xlu1 %v2038_v45, %s2260_s26 }
 0x69d   :  { %v367_v46 = vpop.permute.xlu1 %366 }
 0x69e   :  { %v2451_v47 = vmul.f32 %v367_v46, %v347_v39 }
 0x6a0   :  { %v377_v48 = vrot.slane %v2451_v47, 4 }
 0x6a2   :  { %378 = vrot.lane.b32.xlu2 %v377_v48, %s2261_s3 }
 0x6fc   :  { %v379_v49 = vpop.permute.xlu2 %378 }
 0x6fd   :  { %1958 = vmatmul.msk.f32.vlgmr.msra.gmra.mxu1 %vm160_vm7, %v379_v49 }
 0x77a   :  { %v399_v50 = vpop.f32.mrf.mxu1 }
 0x77b   :  { %v403_v51 = vrot.slane %v399_v50, 2 }
 0x77d   :  { %v405_v52 = vadd.f32 %v403_v51, %v2429_v20 }
 0x77f   :  { %2039 = vtanh.f32 %v405_v52  ;;  %v1959_v54 = vmul.f32 -1.442695, %v405_v52  ;;  %v757_v52 = vld [vmem:[%s2821_s4 + $0x10] sm:$0xff] }
 0x781   :  { %2041 = vpow2.f32 %v1959_v54  ;;  %v755_v54 = vld [vmem:[%s2821_s4] sm:$0xff] }
 0x785   :  { %v2040_v53 = vpop.eup %2039 }
 0x786   :  { %431 = vrot.lane.b32.xlu0 %v2040_v53, %s2260_s26  ;;  %v756_v53 = vld [vmem:[%s2821_s4 + $0x8] sm:$0xff] }
 0x787   :  { %v2042_v55 = vpop.eup %2041 }
 0x788   :  { %v409_v56 = vadd.f32 1.0, %v2042_v55 }
 0x78a   :  { %2043 = vrcp.f32 %v409_v56  ;;  %v421_v62 = vand.u32 2147483648, %v409_v56  ;;  %vm415_vm3 = vweird.f32 %v409_v56  ;;  %v419_v63 = vand.u32 2147483647, %v409_v56 }
 0x78c   :  { %v422_v0 = vor.u32 1.1754944e-38, %v421_v62  ;;  %vm420_vm5 = vcmp.eq.f32.partialorder %v419_v63, 8.507059e+37  ;;  %v2501_v62 = vld [vmem:[#allocation3 + $0x8] sm:$0xff]  ;;  %v2507_v63 = vld [vmem:[#allocation3] sm:$0xff] }
 0x790   :  { %v2044_v57 = vpop.eup %2043 }
 0x791   :  { %v411_v58 = vmul.f32 %v2044_v57, %v409_v56  ;;  %vm416_vm2 = vweird.f32 %v2044_v57 }
 0x792   :  { %vm417_vm4 = vmor %vm415_vm3, %vm416_vm2 }
 0x793   :  { %v412_v59 = vsub.f32 1.0, %v411_v58 }
 0x795   :  { %v413_v60 = vmul.f32 %v2044_v57, %v412_v59 }
 0x797   :  { %v414_v61 = vadd.f32 %v2044_v57, %v413_v60  ;;  %v2491_v60 = vld [vmem:[#allocation3 + $0x18] sm:$0xff] }
 0x798   :  { %831 = vmatpush.msra.mxu3 %v2491_v60  ;;  %896 = vmatpush.msra.mxu0 %v2491_v60 }
 0x799   :  { %v418_v20 = vsel %vm417_vm4, %v2044_v57, %v414_v61  ;;  %v2495_v61 = vld [vmem:[#allocation3 + $0x10] sm:$0xff]  ;;  %970 = vmatpush.msra.mxu1 %v2491_v60 }
 0x79a   :  { %v423_v6 = vsel %vm420_vm5, %v422_v0, %v418_v20  ;;  %832 = vmatpush.msra.mxu3 %v2495_v61  ;;  %897 = vmatpush.msra.mxu0 %v2495_v61 }
 0x79b   :  { %v429_v13 = vmul.f32 %v427_v12, %v423_v6  ;;  %971 = vmatpush.msra.mxu1 %v2495_v61 }
 0x79c   :  { %833 = vmatpush.msra.mxu3 %v2501_v62  ;;  %898 = vmatpush.msra.mxu0 %v2501_v62 }
 0x79d   :  { %972 = vmatpush.msra.mxu1 %v2501_v62 }
 0x79e   :  { %834 = vmatpush.msra.mxu3 %v2507_v63  ;;  %899 = vmatpush.msra.mxu0 %v2507_v63 }
 0x79f   :  { %973 = vmatpush.msra.mxu1 %v2507_v63 }
 0x7f8   :  { %v432_v5 = vpop.permute.xlu0 %431 }
 0x7f9   :  { %v434_v9 = vmul.f32 %v432_v5, %v423_v6 }
 0x7fb   :  { %436 = vrot.lane.b32.xlu1 %v434_v9, %s2261_s3  ;;  %v2529_v9 = vld [vmem:[%s2823_s6] ss:$0 sm:$0xff] }
 0x86d   :  { %v437_v14 = vpop.permute.xlu1 %436 }
 0x86e   :  { %v439_v16 = vadd.f32 %v437_v14, %v429_v13 }
 0x870   :  { %2045 = vtanh.f32 %v439_v16  ;;  %v500_v44 = vrot.slane %v439_v16, 6 }
 0x876   :  { %v2046_v19 = vpop.eup %2045 }
 0x877   :  { %442 = vrot.lane.b32.xlu2 %v2046_v19, %s2260_s26 }
 0x8d1   :  { %v443_v21 = vpop.permute.xlu2 %442 }
 0x8d2   :  { %v445_v22 = vmul.f32 %v443_v21, %v423_v6 }
 0x8d4   :  { %v453_v23 = vrot.slane %v445_v22, 6 }
 0x8d6   :  { %454 = vrot.lane.b32.xlu0 %v453_v23, %s2261_s3 }
 0x948   :  { %v455_v24 = vpop.permute.xlu0 %454 }
 0x949   :  { %1960 = vmatmul.msk.f32.vlgmr.msrb.gmra.mxu2 %vm160_vm7, %v455_v24 }
 0x9cc   :  { %v475_v25 = vpop.f32.mrf.mxu2 }
 0x9cd   :  { %v478_v26 = vadd.f32 %v475_v25, %v2427_v18 }
 0x9cf   :  { %2047 = vtanh.f32 %v478_v26  ;;  %v1961_v28 = vmul.f32 -1.442695, %v478_v26 }
 0x9d1   :  { %2049 = vpow2.f32 %v1961_v28 }
 0x9d5   :  { %v2048_v27 = vpop.eup %2047 }
 0x9d6   :  { %504 = vrot.lane.b32.xlu1 %v2048_v27, %s2260_s26 }
 0x9d7   :  { %v2050_v29 = vpop.eup %2049 }
 0x9d8   :  { %v482_v30 = vadd.f32 1.0, %v2050_v29 }
 0x9da   :  { %2051 = vrcp.f32 %v482_v30  ;;  %v494_v36 = vand.u32 2147483648, %v482_v30  ;;  %vm488_vm9 = vweird.f32 %v482_v30  ;;  %v492_v37 = vand.u32 2147483647, %v482_v30 }
 0x9dc   :  { %v495_v39 = vor.u32 1.1754944e-38, %v494_v36  ;;  %vm493_vm11 = vcmp.eq.f32.partialorder %v492_v37, 8.507059e+37 }
 0x9de   :  { %295 = vrot.lane.b32.xlu1 %v2442_v17, %s2261_s3 }
 0x9e0   :  { %v2052_v31 = vpop.eup %2051 }
 0x9e1   :  { %v484_v32 = vmul.f32 %v2052_v31, %v482_v30  ;;  %vm489_vm8 = vweird.f32 %v2052_v31 }
 0x9e2   :  { %vm490_vm10 = vmor %vm488_vm9, %vm489_vm8 }
 0x9e3   :  { %v485_v33 = vsub.f32 1.0, %v484_v32 }
 0x9e5   :  { %v486_v34 = vmul.f32 %v2052_v31, %v485_v33 }
 0x9e7   :  { %v487_v35 = vadd.f32 %v2052_v31, %v486_v34 }
 0x9e9   :  { %v491_v38 = vsel %vm490_vm10, %v2052_v31, %v487_v35 }
 0x9ea   :  { %v496_v17 = vsel %vm493_vm11, %v495_v39, %v491_v38 }
 0x9eb   :  { %v502_v45 = vmul.f32 %v500_v44, %v496_v17 }
 0xa48   :  { %v505_v40 = vpop.permute.xlu1 %504 }
 0xa49   :  { %v507_v41 = vmul.f32 %v505_v40, %v496_v17 }
 0xa4b   :  { %509 = vrot.lane.b32.xlu2 %v507_v41, %s2261_s3 }
 0xa50   :  { %v296_v42 = vpop.permute.xlu1 %295 }
 0xa51   :  { %300 = vst.msk [vmem:[#allocation2] sm:$0xc] %vm299_vm12, %v296_v42 }
 0xa53   :  { %371 = vrot.lane.b32.xlu2 %v2451_v47, %s2261_s3  ;;  %v758_v47 = vld [vmem:[%s2821_s4 + $0x18] sm:$0xff] }
 0xa54   :  { %808 = vmatpush.msra.mxu2 %v758_v47 }
 0xa56   :  { %809 = vmatpush.msra.mxu2 %v757_v52 }
 0xa58   :  { %v748_v43 = vld [vmem:[#allocation2 + $0x2] sm:$0x3]  ;;  %810 = vmatpush.msra.mxu2 %v756_v53 }
 0xa59   :  { %777 = vst [vmem:[#allocation1 + $0x1] ss:$4 sm:$0xff] %v748_v43 }
 0xa5a   :  { %811 = vmatpush.msra.mxu2 %v755_v54 }
 0xa5c   :  { %1260 = vmatpush.msrb.mxu2 %v2491_v60 }
 0xa5e   :  { %1261 = vmatpush.msrb.mxu2 %v2495_v61 }
 0xa60   :  { %1262 = vmatpush.msrb.mxu2 %v2501_v62 }
 0xa62   :  { %1263 = vmatpush.msrb.mxu2 %v2507_v63 }
 0xaa5   :  { %v510_v46 = vpop.permute.xlu2 %509 }
 0xaa6   :  { %v2470_v48 = vadd.f32 %v510_v46, %v502_v45 }
 0xaa8   :  { %2053 = vtanh.f32 %v2470_v48  ;;  %v572_v52 = vrot.slane %v2470_v48, 6 }
 0xaad   :  { %v372_v49 = vpop.permute.xlu2 %371 }
 0xaae   :  { %v2054_v50 = vpop.eup %2053  ;;  %376 = vst.msk [vmem:[#allocation2] sm:$0x30] %vm375_vm13, %v372_v49 }
 0xaaf   :  { %515 = vrot.lane.b32.xlu0 %v2054_v50, %s2260_s26 }
 0xab5   :  { %v749_v51 = vld [vmem:[#allocation2 + $0x4] sm:$0x3] }
 0xab6   :  { %779 = vst [vmem:[#allocation1 + $0x2] ss:$4 sm:$0xff] %v749_v51 }
 0xab7   :  { %447 = vrot.lane.b32.xlu0 %v445_v22, %s2261_s3 }
 0xb21   :  { %v516_v55 = vpop.permute.xlu0 %515 }
 0xb22   :  { %v518_v56 = vmul.f32 %v516_v55, %v496_v17 }
 0xb24   :  { %520 = vrot.lane.b32.xlu1 %v518_v56, %s2261_s3 }
 0xb29   :  { %v448_v57 = vpop.permute.xlu0 %447 }
 0xb2a   :  { %452 = vst.msk [vmem:[#allocation2] sm:$0xc0] %vm451_vm14, %v448_v57 }
 0xb31   :  { %v750_v58 = vld [vmem:[#allocation2 + $0x6] sm:$0x3] }
 0xb32   :  { %781 = vst [vmem:[#allocation1 + $0x3] ss:$4 sm:$0xff] %v750_v58 }
 0xb39   :  { %v790_v59 = vld.sshfl [vmem:[#allocation1] sm:$0xff pattern:$0x73625140] }
 0xb3a   :  { %1968 = vmatmul.msk.f32.vlgmr.msra.gmra.mxu2 %vm160_vm7, %v790_v59 }
 0xb96   :  { %v521_v20 = vpop.permute.xlu1 %520 }
 0xb97   :  { %524 = vst.msk [vmem:[#allocation2 + $0x8] sm:$0x3] %vm226_vm6, %v521_v20  ;;  %1962 = vmatmul.msk.f32.vlgmr.msrb.gmra.mxu3 %vm160_vm7, %v521_v20 }
 0xb98   :  { %1044 = vmatpush.msrb.mxu3 %v2491_v60 }
 0xb9a   :  { %1045 = vmatpush.msrb.mxu3 %v2495_v61 }
 0xb9c   :  { %1046 = vmatpush.msrb.mxu3 %v2501_v62 }
 0xb9e   :  { %v751_v0 = vld [vmem:[#allocation2 + $0x8] sm:$0x3]  ;;  %1047 = vmatpush.msrb.mxu3 %v2507_v63 }
 0xb9f   :  { %783 = vst [vmem:[#allocation1 + $0x20] ss:$4 sm:$0xff] %v751_v0  ;;  %835 = vmatmul.f32.vlgmr.msra.gmra.mxu3 %v2259_v15 }
 0xba0   :  { %1334 = vmatpush.msra.mxu3 %v2491_v60 }
 0xba2   :  { %1335 = vmatpush.msra.mxu3 %v2495_v61 }
 0xba4   :  { %1336 = vmatpush.msra.mxu3 %v2501_v62 }
 0xba6   :  { %1337 = vmatpush.msra.mxu3 %v2507_v63 }
 0xbbd   :  { %v813_v13 = vpop.f32.mrf.mxu2 }
 0xbbe   :  { %v2533_v15 = vadd.f32 %v2529_v9, %v813_v13 }
 0xc1a   :  { %v544_v5 = vpop.f32.mrf.mxu3 }
 0xc1b   :  { %v548_v6 = vrot.slane %v544_v5, 6 }
 0xc1d   :  { %v550_v12 = vadd.f32 %v548_v6, %v2427_v18 }
 0xc1f   :  { %2055 = vtanh.f32 %v550_v12  ;;  %v1963_v22 = vmul.f32 -1.442695, %v550_v12 }
 0xc22   :  { %v836_v14 = vpop.f32.mrf.mxu3 }
 0xc23   :  { %v839_v16 = vadd.f32 %v836_v14, %v2533_v15 }
 0xc25   :  { %v2056_v19 = vpop.eup %2055  ;;  %2057 = vtanh.f32 %v839_v16  ;;  %v1970_v27 = vmul.f32 -1.442695, %v839_v16 }
 0xc26   :  { %576 = vrot.lane.b32.xlu2 %v2056_v19, %s2260_s26  ;;  %2059 = vpow2.f32 %v1963_v22 }
 0xc2b   :  { %v2058_v21 = vpop.eup %2057 }
 0xc2c   :  { %862 = vrot.lane.b32.xlu0 %v2058_v21, %s2260_s26  ;;  %v2060_v23 = vpop.eup %2059 }
 0xc2d   :  { %v554_v24 = vadd.f32 1.0, %v2060_v23 }
 0xc2f   :  { %2061 = vrcp.f32 %v554_v24  ;;  %v566_v31 = vand.u32 2147483648, %v554_v24  ;;  %vm560_vm2 = vweird.f32 %v554_v24  ;;  %v564_v33 = vand.u32 2147483647, %v554_v24 }
 0xc30   :  { %2063 = vpow2.f32 %v1970_v27 }
 0xc31   :  { %v567_v36 = vor.u32 1.1754944e-38, %v566_v31  ;;  %vm565_vm4 = vcmp.eq.f32.partialorder %v564_v33, 8.507059e+37 }
 0xc35   :  { %v2062_v25 = vpop.eup %2061 }
 0xc36   :  { %v556_v26 = vmul.f32 %v2062_v25, %v554_v24  ;;  %vm561_vm15 = vweird.f32 %v2062_v25  ;;  %v2064_v32 = vpop.eup %2063 }
 0xc37   :  { %vm562_vm3 = vmor %vm560_vm2, %vm561_vm15  ;;  %v843_v35 = vadd.f32 1.0, %v2064_v32 }
 0xc38   :  { %v557_v28 = vsub.f32 1.0, %v556_v26 }
 0xc39   :  { %2065 = vrcp.f32 %v843_v35  ;;  %v855_v44 = vand.u32 2147483648, %v843_v35  ;;  %vm849_vm8 = vweird.f32 %v843_v35  ;;  %v853_v45 = vand.u32 2147483647, %v843_v35 }
 0xc3a   :  { %v558_v29 = vmul.f32 %v2062_v25, %v557_v28 }
 0xc3b   :  { %v856_v49 = vor.u32 1.1754944e-38, %v855_v44  ;;  %vm854_vm10 = vcmp.eq.f32.partialorder %v853_v45, 8.507059e+37 }
 0xc3c   :  { %v559_v30 = vadd.f32 %v2062_v25, %v558_v29 }
 0xc3e   :  { %v563_v34 = vsel %vm562_vm3, %v2062_v25, %v559_v30 }
 0xc3f   :  { %v568_v38 = vsel %vm565_vm4, %v567_v36, %v563_v34  ;;  %v2066_v40 = vpop.eup %2065 }
 0xc40   :  { %v845_v17 = vmul.f32 %v2066_v40, %v843_v35  ;;  %vm850_vm5 = vweird.f32 %v2066_v40  ;;  %v574_v53 = vmul.f32 %v572_v52, %v568_v38 }
 0xc41   :  { %vm851_vm9 = vmor %vm849_vm8, %vm850_vm5 }
 0xc42   :  { %v846_v41 = vsub.f32 1.0, %v845_v17 }
 0xc44   :  { %v847_v42 = vmul.f32 %v2066_v40, %v846_v41 }
 0xc46   :  { %v848_v43 = vadd.f32 %v2066_v40, %v847_v42 }
 0xc48   :  { %v852_v46 = vsel %vm851_vm9, %v2066_v40, %v848_v43 }
 0xc49   :  { %v857_v51 = vsel %vm854_vm10, %v856_v49, %v852_v46 }
 0xc4a   :  { %v860_v56 = vmul.f32 0.0, %v857_v51 }
 0xc80   :  { %v577_v37 = vpop.permute.xlu2 %576 }
 0xc81   :  { %v579_v39 = vmul.f32 %v577_v37, %v568_v38 }
 0xc83   :  { %581 = vrot.lane.b32.xlu1 %v579_v39, %s2261_s3 }
 0xc9e   :  { %v863_v50 = vpop.permute.xlu0 %862 }
 0xc9f   :  { %v865_v47 = vmul.f32 %v863_v50, %v857_v51 }
 0xca1   :  { %867 = vrot.lane.b32.xlu2 %v865_v47, %s2261_s3 }
 0xcf5   :  { %v582_v54 = vpop.permute.xlu1 %581 }
 0xcf6   :  { %v2541_v55 = vadd.f32 %v582_v54, %v574_v53 }
 0xcf8   :  { %2067 = vtanh.f32 %v2541_v55 }
 0xcfb   :  { %v868_v57 = vpop.permute.xlu2 %867 }
 0xcfc   :  { %v2544_v58 = vadd.f32 %v868_v57, %v860_v56 }
 0xcfe   :  { %v2068_v59 = vpop.eup %2067  ;;  %2069 = vtanh.f32 %v2544_v58 }
 0xcff   :  { %587 = vrot.lane.b32.xlu0 %v2068_v59, %s2260_s26 }
 0xd04   :  { %v2070_v20 = vpop.eup %2069 }
 0xd05   :  { %873 = vrot.lane.b32.xlu1 %v2070_v20, %s2260_s26  ;;  %v647_v20 = vrot.slane %v2541_v55, 6 }
 0xd71   :  { %v588_v0 = vpop.permute.xlu0 %587 }
 0xd72   :  { %v2549_v48 = vmul.f32 %v588_v0, %v568_v38 }
 0xd74   :  { %v597_v5 = vrot.slane %v2549_v48, 2 }
 0xd76   :  { %598 = vrot.lane.b32.xlu2 %v597_v5, %s2261_s3 }
 0xd77   :  { %v874_v6 = vpop.permute.xlu1 %873 }
 0xd78   :  { %v876_v12 = vmul.f32 %v874_v6, %v857_v51  ;;  %v929_v6 = vrot.slane %v2544_v58, 6 }
 0xd7a   :  { %878 = vrot.lane.b32.xlu0 %v876_v12, %s2261_s3 }
 0xdd0   :  { %v599_v13 = vpop.permute.xlu2 %598 }
 0xdd1   :  { %1964 = vmatmul.msk.f32.vlgmr.msrb.gmra.mxu0 %vm160_vm7, %v599_v13 }
 0xdd2   :  { %1118 = vmatpush.msrb.mxu0 %v2491_v60 }
 0xdd4   :  { %1119 = vmatpush.msrb.mxu0 %v2495_v61 }
 0xdd6   :  { %1120 = vmatpush.msrb.mxu0 %v2501_v62 }
 0xdd8   :  { %1121 = vmatpush.msrb.mxu0 %v2507_v63 }
 0xdec   :  { %v879_v14 = vpop.permute.xlu0 %878 }
 0xded   :  { %881 = vst.msk [vmem:[#allocation2] sm:$0x3] %vm226_vm6, %v879_v14  ;;  %1971 = vmatmul.msk.f32.vlgmr.msra.gmra.mxu0 %vm160_vm7, %v879_v14 }
 0xdf4   :  { %v2561_v16 = vld [vmem:[#allocation2] sm:$0x3] }
 0xdf5   :  { %1412 = vst [vmem:[#allocation1] ss:$4 sm:$0xff] %v2561_v16 }
 0xe4e   :  { %v619_v19 = vpop.f32.mrf.mxu0 }
 0xe4f   :  { %v623_v21 = vrot.slane %v619_v19, 4 }
 0xe51   :  { %v625_v22 = vadd.f32 %v623_v21, %v2427_v18 }
 0xe53   :  { %2071 = vtanh.f32 %v625_v22  ;;  %v1965_v28 = vmul.f32 -1.442695, %v625_v22 }
 0xe59   :  { %v2072_v23 = vpop.eup %2071 }
 0xe5a   :  { %651 = vrot.lane.b32.xlu1 %v2072_v23, %s2260_s26 }
 0xe6a   :  { %v901_v24 = vpop.f32.mrf.mxu0 }
 0xe6b   :  { %v905_v25 = vrot.slane %v901_v24, 6 }
 0xe6d   :  { %v907_v26 = vadd.f32 %v905_v25, %v2533_v15 }
 0xe6f   :  { %2073 = vtanh.f32 %v907_v26  ;;  %v1972_v29 = vmul.f32 -1.442695, %v907_v26 }
 0xe70   :  { %2075 = vpow2.f32 %v1965_v28 }
 0xe71   :  { %2077 = vpow2.f32 %v1972_v29 }
 0xe75   :  { %v2074_v27 = vpop.eup %2073 }
 0xe76   :  { %933 = vrot.lane.b32.xlu2 %v2074_v27, %s2260_s26  ;;  %v2076_v30 = vpop.eup %2075 }
 0xe77   :  { %v629_v31 = vadd.f32 1.0, %v2076_v30  ;;  %v2078_v32 = vpop.eup %2077 }
 0xe78   :  { %v911_v33 = vadd.f32 1.0, %v2078_v32 }
 0xe79   :  { %2079 = vrcp.f32 %v629_v31  ;;  %v641_v42 = vand.u32 2147483648, %v629_v31  ;;  %vm635_vm15 = vweird.f32 %v629_v31  ;;  %v639_v43 = vand.u32 2147483647, %v629_v31 }
 0xe7a   :  { %2081 = vrcp.f32 %v911_v33  ;;  %v923_v49 = vand.u32 2147483648, %v911_v33  ;;  %vm917_vm5 = vweird.f32 %v911_v33  ;;  %v921_v50 = vand.u32 2147483647, %v911_v33 }
 0xe7b   :  { %v642_v46 = vor.u32 1.1754944e-38, %v641_v42  ;;  %vm640_vm4 = vcmp.eq.f32.partialorder %v639_v43, 8.507059e+37 }
 0xe7c   :  { %v924_v54 = vor.u32 1.1754944e-38, %v923_v49  ;;  %vm922_vm9 = vcmp.eq.f32.partialorder %v921_v50, 8.507059e+37 }
 0xe7f   :  { %v2080_v34 = vpop.eup %2079 }
 0xe80   :  { %v631_v35 = vmul.f32 %v2080_v34, %v629_v31  ;;  %v2082_v36 = vpop.eup %2081  ;;  %vm636_vm11 = vweird.f32 %v2080_v34 }
 0xe81   :  { %v913_v38 = vmul.f32 %v2082_v36, %v911_v33  ;;  %vm637_vm2 = vmor %vm635_vm15, %vm636_vm11  ;;  %vm918_vm3 = vweird.f32 %v2082_v36 }
 0xe82   :  { %v632_v37 = vsub.f32 1.0, %v631_v35  ;;  %vm919_vm8 = vmor %vm917_vm5, %vm918_vm3 }
 0xe83   :  { %v914_v40 = vsub.f32 1.0, %v913_v38 }
 0xe84   :  { %v633_v39 = vmul.f32 %v2080_v34, %v632_v37 }
 0xe85   :  { %v915_v41 = vmul.f32 %v2082_v36, %v914_v40 }
 0xe86   :  { %v634_v17 = vadd.f32 %v2080_v34, %v633_v39 }
 0xe87   :  { %v916_v45 = vadd.f32 %v2082_v36, %v915_v41 }
 0xe88   :  { %v638_v44 = vsel %vm637_vm2, %v2080_v34, %v634_v17 }
 0xe89   :  { %v643_v51 = vsel %vm640_vm4, %v642_v46, %v638_v44  ;;  %v920_v53 = vsel %vm919_vm8, %v2082_v36, %v916_v45 }
 0xe8a   :  { %v925_v57 = vsel %vm922_vm9, %v924_v54, %v920_v53  ;;  %v649_v0 = vmul.f32 %v647_v20, %v643_v51 }
 0xe8b   :  { %v931_v13 = vmul.f32 %v929_v6, %v925_v57 }
 0xecc   :  { %v652_v47 = vpop.permute.xlu1 %651 }
 0xecd   :  { %v654_v52 = vmul.f32 %v652_v47, %v643_v51 }
 0xecf   :  { %656 = vrot.lane.b32.xlu0 %v654_v52, %s2261_s3 }
 0xed0   :  { %v934_v56 = vpop.permute.xlu2 %933 }
 0xed1   :  { %v936_v59 = vmul.f32 %v934_v56, %v925_v57 }
 0xed3   :  { %938 = vrot.lane.b32.xlu1 %v936_v59, %s2261_s3 }
 0xf41   :  { %v657_v5 = vpop.permute.xlu0 %656 }
 0xf42   :  { %v2572_v12 = vadd.f32 %v657_v5, %v649_v0 }
 0xf44   :  { %2083 = vtanh.f32 %v2572_v12 }
 0xf45   :  { %v939_v14 = vpop.permute.xlu1 %938 }
 0xf46   :  { %v941_v19 = vadd.f32 %v939_v14, %v931_v13 }
 0xf48   :  { %2085 = vtanh.f32 %v941_v19  ;;  %v1003_v49 = vrot.slane %v941_v19, 6 }
 0xf4a   :  { %v2084_v21 = vpop.eup %2083 }
 0xf4b   :  { %662 = vrot.lane.b32.xlu2 %v2084_v21, %s2260_s26 }
 0xf4e   :  { %v2086_v22 = vpop.eup %2085 }
 0xf4f   :  { %944 = vrot.lane.b32.xlu0 %v2086_v22, %s2260_s26 }
 0xfa5   :  { %v663_v23 = vpop.permute.xlu2 %662 }
 0xfa6   :  { %v2577_v55 = vmul.f32 %v663_v23, %v643_v51 }
 0xfa8   :  { %v672_v24 = vrot.slane %v2577_v55, 4 }
 0xfaa   :  { %673 = vrot.lane.b32.xlu1 %v672_v24, %s2261_s3 }
 0xfc1   :  { %v945_v58 = vpop.permute.xlu0 %944 }
 0xfc2   :  { %v2581_v25 = vmul.f32 %v945_v58, %v925_v57 }
 0xfc4   :  { %v953_v26 = vrot.slane %v2581_v25, 2 }
 0xfc6   :  { %954 = vrot.lane.b32.xlu2 %v953_v26, %s2261_s3 }
0x101c   :  { %v674_v27 = vpop.permute.xlu1 %673 }
0x101d   :  { %1966 = vmatmul.msk.f32.vlgmr.msrb.gmra.mxu1 %vm160_vm7, %v674_v27 }
0x101e   :  { %1186 = vmatpush.msrb.mxu1 %v2491_v60 }
0x1020   :  { %1187 = vmatpush.msrb.mxu1 %v2495_v61  ;;  %v955_v28 = vpop.permute.xlu2 %954 }
0x1022   :  { %1188 = vmatpush.msrb.mxu1 %v2501_v62 }
0x1024   :  { %1189 = vmatpush.msrb.mxu1 %v2507_v63 }
0x1025   :  { %1973 = vmatmul.msk.f32.vlgmr.msra.gmra.mxu1 %vm160_vm7, %v955_v28 }
0x109a   :  { %v694_v29 = vpop.f32.mrf.mxu1 }
0x109b   :  { %v698_v40 = vrot.slane %v694_v29, 2 }
0x109d   :  { %v700_v42 = vadd.f32 %v698_v40, %v2427_v18 }
0x109f   :  { %v1967_v18 = vmul.f32 -1.442695, %v700_v42 }
0x10a2   :  { %v975_v30 = vpop.f32.mrf.mxu1 }
0x10a3   :  { %v979_v31 = vrot.slane %v975_v30, 4  ;;  %v722_v30 = vrot.slane %v2572_v12, 6 }
0x10a5   :  { %v981_v32 = vadd.f32 %v979_v31, %v2533_v15 }
0x10a7   :  { %2087 = vtanh.f32 %v981_v32  ;;  %v1974_v34 = vmul.f32 -1.442695, %v981_v32 }
0x10a9   :  { %2089 = vpow2.f32 %v1974_v34 }
0x10ad   :  { %v2088_v33 = vpop.eup %2087 }
0x10ae   :  { %1007 = vrot.lane.b32.xlu0 %v2088_v33, %s2260_s26 }
0x10af   :  { %v2090_v60 = vpop.eup %2089 }
0x10b0   :  { %v985_v61 = vadd.f32 1.0, %v2090_v60 }
0x10b2   :  { %2091 = vrcp.f32 %v985_v61  ;;  %v997_v38 = vand.u32 2147483648, %v985_v61  ;;  %vm991_vm11 = vweird.f32 %v985_v61  ;;  %v995_v39 = vand.u32 2147483647, %v985_v61 }
0x10b3   :  { %2093 = vtanh.f32 %v700_v42 }
0x10b4   :  { %v998_v41 = vor.u32 1.1754944e-38, %v997_v38  ;;  %vm996_vm2 = vcmp.eq.f32.partialorder %v995_v39, 8.507059e+37 }
0x10b8   :  { %v2092_v62 = vpop.eup %2091 }
0x10b9   :  { %v987_v35 = vmul.f32 %v2092_v62, %v985_v61  ;;  %vm992_vm10 = vweird.f32 %v2092_v62  ;;  %v2094_v46 = vpop.eup %2093 }
0x10ba   :  { %vm993_vm15 = vmor %vm991_vm11, %vm992_vm10 }
0x10bb   :  { %v988_v36 = vsub.f32 1.0, %v987_v35 }
0x10bd   :  { %v989_v63 = vmul.f32 %v2092_v62, %v988_v36 }
0x10bf   :  { %v990_v37 = vadd.f32 %v2092_v62, %v989_v63 }
0x10c1   :  { %v994_v17 = vsel %vm993_vm15, %v2092_v62, %v990_v37 }
0x10c2   :  { %v999_v44 = vsel %vm996_vm2, %v998_v41, %v994_v17 }
0x10c3   :  { %v1005_v50 = vmul.f32 %v1003_v49, %v999_v44 }
0x1120   :  { %v1008_v43 = vpop.permute.xlu0 %1007 }
0x1121   :  { %v1010_v45 = vmul.f32 %v1008_v43, %v999_v44 }
0x1123   :  { %1012 = vrot.lane.b32.xlu1 %v1010_v45, %s2261_s3 }
0x112b   :  { %726 = vrot.lane.b32.xlu1 %v2094_v46, %s2260_s26 }
0x1195   :  { %v1013_v51 = vpop.permute.xlu1 %1012 }
0x1196   :  { %v2596_v47 = vadd.f32 %v1013_v51, %v1005_v50 }
0x1198   :  { %2095 = vtanh.f32 %v2596_v47  ;;  %v1077_v46 = vrot.slane %v2596_v47, 6 }
0x1199   :  { %2097 = vpow2.f32 %v1967_v18 }
0x119d   :  { %v727_v22 = vpop.permute.xlu1 %726 }
0x119e   :  { %v2096_v52 = vpop.eup %2095 }
0x119f   :  { %1018 = vrot.lane.b32.xlu2 %v2096_v52, %s2260_s26  ;;  %v2098_v53 = vpop.eup %2097 }
0x11a0   :  { %v704_v54 = vadd.f32 1.0, %v2098_v53 }
0x11a2   :  { %2099 = vrcp.f32 %v704_v54  ;;  %v716_v14 = vand.u32 2147483648, %v704_v54  ;;  %vm710_vm4 = vweird.f32 %v704_v54  ;;  %v714_v19 = vand.u32 2147483647, %v704_v54 }
0x11a4   :  { %v717_v23 = vor.u32 1.1754944e-38, %v716_v14  ;;  %vm715_vm8 = vcmp.eq.f32.partialorder %v714_v19, 8.507059e+37 }
0x11a8   :  { %v2100_v56 = vpop.eup %2099 }
0x11a9   :  { %v706_v57 = vmul.f32 %v2100_v56, %v704_v54  ;;  %vm711_vm3 = vweird.f32 %v2100_v56 }
0x11aa   :  { %vm712_vm5 = vmor %vm710_vm4, %vm711_vm3 }
0x11ab   :  { %v707_v59 = vsub.f32 1.0, %v706_v57 }
0x11ad   :  { %v708_v20 = vmul.f32 %v2100_v56, %v707_v59 }
0x11af   :  { %v709_v6 = vadd.f32 %v2100_v56, %v708_v20 }
0x11b1   :  { %v713_v21 = vsel %vm712_vm5, %v2100_v56, %v709_v6 }
0x11b2   :  { %v718_v24 = vsel %vm715_vm8, %v717_v23, %v713_v21 }
0x11b3   :  { %v729_v58 = vmul.f32 %v727_v22, %v718_v24  ;;  %v724_v32 = vmul.f32 %v722_v30, %v718_v24 }
0x11f9   :  { %v1019_v0 = vpop.permute.xlu2 %1018 }
0x11fa   :  { %v2600_v5 = vmul.f32 %v1019_v0, %v999_v44 }
0x11fc   :  { %v1027_v13 = vrot.slane %v2600_v5, 4 }
0x11fe   :  { %1028 = vrot.lane.b32.xlu0 %v1027_v13, %s2261_s3 }
0x1206   :  { %731 = vrot.lane.b32.xlu0 %v729_v58, %s2261_s3 }
0x1270   :  { %v1029_v26 = vpop.permute.xlu0 %1028 }
0x1271   :  { %1975 = vmatmul.msk.f32.vlgmr.msrb.gmra.mxu3 %vm160_vm7, %v1029_v26 }
0x1278   :  { %v732_v31 = vpop.permute.xlu0 %731 }
0x1279   :  { %v734_v33 = vadd.f32 %v732_v31, %v724_v32 }
0x12f4   :  { %v1049_v27 = vpop.f32.mrf.mxu3 }
0x12f5   :  { %v1053_v28 = vrot.slane %v1049_v27, 2 }
0x12f7   :  { %v1055_v29 = vadd.f32 %v1053_v28, %v2533_v15 }
0x12f9   :  { %2101 = vtanh.f32 %v1055_v29  ;;  %v1976_v61 = vmul.f32 -1.442695, %v1055_v29 }
0x12fa   :  { %2103 = vtanh.f32 %v734_v33 }
0x12fb   :  { %2105 = vpow2.f32 %v1976_v61 }
0x12ff   :  { %v2102_v34 = vpop.eup %2101 }
0x1300   :  { %1081 = vrot.lane.b32.xlu2 %v2102_v34, %s2260_s26  ;;  %v2104_v60 = vpop.eup %2103 }
0x1301   :  { %v2106_v62 = vpop.eup %2105 }
0x1302   :  { %v1059_v15 = vadd.f32 1.0, %v2106_v62 }
0x1304   :  { %2107 = vrcp.f32 %v1059_v15  ;;  %v1071_v38 = vand.u32 2147483648, %v1059_v15  ;;  %vm1065_vm10 = vweird.f32 %v1059_v15  ;;  %v1069_v39 = vand.u32 2147483647, %v1059_v15 }
0x1306   :  { %v1072_v17 = vor.u32 1.1754944e-38, %v1071_v38  ;;  %vm1070_vm15 = vcmp.eq.f32.partialorder %v1069_v39, 8.507059e+37 }
0x1308   :  { %737 = vrot.lane.b32.xlu2 %v2104_v60, %s2260_s26 }
0x130a   :  { %v2108_v12 = vpop.eup %2107 }
0x130b   :  { %v1061_v35 = vmul.f32 %v2108_v12, %v1059_v15  ;;  %vm1066_vm9 = vweird.f32 %v2108_v12 }
0x130c   :  { %vm1067_vm11 = vmor %vm1065_vm10, %vm1066_vm9 }
0x130d   :  { %v1062_v36 = vsub.f32 1.0, %v1061_v35 }
0x130f   :  { %v1063_v63 = vmul.f32 %v2108_v12, %v1062_v36 }
0x1310   :  { %667 = vrot.lane.b32.xlu2 %v2577_v55, %s2261_s3 }
0x1311   :  { %v1064_v37 = vadd.f32 %v2108_v12, %v1063_v63 }
0x1313   :  { %v1068_v40 = vsel %vm1067_vm11, %v2108_v12, %v1064_v37 }
0x1314   :  { %v1073_v55 = vsel %vm1070_vm15, %v1072_v17, %v1068_v40 }
0x1315   :  { %v1079_v49 = vmul.f32 %v1077_v46, %v1073_v55 }
0x135a   :  { %v1082_v41 = vpop.permute.xlu2 %1081 }
0x135b   :  { %v1084_v42 = vmul.f32 %v1082_v41, %v1073_v55 }
0x135d   :  { %1086 = vrot.lane.b32.xlu1 %v1084_v42, %s2261_s3 }
0x1362   :  { %v738_v43 = vpop.permute.xlu2 %737 }
0x1363   :  { %v740_v53 = vmul.f32 %v738_v43, %v718_v24 }
0x1365   :  { %592 = vrot.lane.b32.xlu1 %v2549_v48, %s2261_s3 }
0x136a   :  { %v668_v44 = vpop.permute.xlu2 %667 }
0x136b   :  { %671 = vst.msk [vmem:[#allocation2 + $0x8] sm:$0x30] %vm375_vm13, %v668_v44 }
0x1372   :  { %v753_v45 = vld [vmem:[#allocation2 + $0xc] sm:$0x3] }
0x1373   :  { %787 = vst [vmem:[#allocation1 + $0x22] ss:$4 sm:$0xff] %v753_v45 }
0x13cf   :  { %v1087_v50 = vpop.permute.xlu1 %1086 }
0x13d0   :  { %v1089_v51 = vadd.f32 %v1087_v50, %v1079_v49 }
0x13d2   :  { %2109 = vtanh.f32 %v1089_v51  ;;  %v1148_v61 = vrot.slane %v1089_v51, 6 }
0x13d7   :  { %v593_v52 = vpop.permute.xlu1 %592 }
0x13d8   :  { %v2110_v18 = vpop.eup %2109  ;;  %596 = vst.msk [vmem:[#allocation2 + $0x8] sm:$0xc] %vm299_vm12, %v593_v52 }
0x13d9   :  { %1092 = vrot.lane.b32.xlu0 %v2110_v18, %s2260_s26 }
0x13df   :  { %v752_v54 = vld [vmem:[#allocation2 + $0xa] sm:$0x3] }
0x13e0   :  { %785 = vst [vmem:[#allocation1 + $0x21] ss:$4 sm:$0xff] %v752_v54 }
0x13e1   :  { %742 = vrot.lane.b32.xlu0 %v740_v53, %s2261_s3 }
0x144b   :  { %v1093_v48 = vpop.permute.xlu0 %1092 }
0x144c   :  { %v2620_v56 = vmul.f32 %v1093_v48, %v1073_v55 }
0x144e   :  { %v1101_v47 = vrot.slane %v2620_v56, 6 }
0x1450   :  { %1102 = vrot.lane.b32.xlu1 %v1101_v47, %s2261_s3 }
0x1453   :  { %v743_v57 = vpop.permute.xlu0 %742 }
0x1454   :  { %746 = vst.msk [vmem:[#allocation2 + $0x8] sm:$0xc0] %vm451_vm14, %v743_v57 }
0x145b   :  { %v754_v59 = vld [vmem:[#allocation2 + $0xe] sm:$0x3] }
0x145c   :  { %789 = vst [vmem:[#allocation1 + $0x23] ss:$4 sm:$0xff] %v754_v59 }
0x1463   :  { %v791_v20 = vld.sshfl [vmem:[#allocation1 + $0x20] sm:$0xff pattern:$0x73625140] }
0x1464   :  { %1969 = vmatmul.msk.f32.gmra.mxu2 %vm160_vm7, %v791_v20 }
0x14c2   :  { %v1103_v0 = vpop.permute.xlu1 %1102 }
0x14c3   :  { %1977 = vmatmul.msk.f32.vlgmr.msrb.gmra.mxu0 %vm160_vm7, %v1103_v0 }
0x14e7   :  { %v816_v6 = vpop.f32.mrf.mxu2 }
0x14e8   :  { %v2628_v13 = vadd.f32 %v2529_v9, %v816_v6 }
0x1540   :  { %v1123_v14 = vpop.f32.mrf.mxu0 }
0x1541   :  { %v1126_v19 = vadd.f32 %v1123_v14, %v2628_v13 }
0x1543   :  { %2111 = vtanh.f32 %v1126_v19  ;;  %v1978_v22 = vmul.f32 -1.442695, %v1126_v19 }
0x1545   :  { %2113 = vpow2.f32 %v1978_v22 }
0x1549   :  { %v2112_v21 = vpop.eup %2111 }
0x154a   :  { %1152 = vrot.lane.b32.xlu2 %v2112_v21, %s2260_s26 }
0x154b   :  { %v2114_v23 = vpop.eup %2113 }
0x154c   :  { %v1130_v24 = vadd.f32 1.0, %v2114_v23 }
0x154e   :  { %2115 = vrcp.f32 %v1130_v24  ;;  %v1142_v9 = vand.u32 2147483648, %v1130_v24  ;;  %vm1136_vm3 = vweird.f32 %v1130_v24  ;;  %v1140_v30 = vand.u32 2147483647, %v1130_v24 }
0x1550   :  { %v1143_v32 = vor.u32 1.1754944e-38, %v1142_v9  ;;  %vm1141_vm5 = vcmp.eq.f32.partialorder %v1140_v30, 8.507059e+37 }
0x1554   :  { %v2116_v58 = vpop.eup %2115 }
0x1555   :  { %v1132_v26 = vmul.f32 %v2116_v58, %v1130_v24  ;;  %vm1137_vm2 = vweird.f32 %v2116_v58 }
0x1556   :  { %vm1138_vm4 = vmor %vm1136_vm3, %vm1137_vm2 }
0x1557   :  { %v1133_v27 = vsub.f32 1.0, %v1132_v26 }
0x1559   :  { %v1134_v28 = vmul.f32 %v2116_v58, %v1133_v27 }
0x155b   :  { %v1135_v29 = vadd.f32 %v2116_v58, %v1134_v28 }
0x155d   :  { %v1139_v31 = vsel %vm1138_vm4, %v2116_v58, %v1135_v29 }
0x155e   :  { %v1144_v34 = vsel %vm1141_vm5, %v1143_v32, %v1139_v31 }
0x155f   :  { %v1150_v62 = vmul.f32 %v1148_v61, %v1144_v34 }
0x15a4   :  { %v1153_v33 = vpop.permute.xlu2 %1152 }
0x15a5   :  { %v1155_v60 = vmul.f32 %v1153_v33, %v1144_v34 }
0x15a7   :  { %1157 = vrot.lane.b32.xlu0 %v1155_v60, %s2261_s3 }
0x1619   :  { %v1158_v15 = vpop.permute.xlu0 %1157 }
0x161a   :  { %v1160_v12 = vadd.f32 %v1158_v15, %v1150_v62 }
0x161c   :  { %2117 = vtanh.f32 %v1160_v12  ;;  %v1219_v57 = vrot.slane %v1160_v12, 6 }
0x1622   :  { %v2118_v35 = vpop.eup %2117 }
0x1623   :  { %1163 = vrot.lane.b32.xlu1 %v2118_v35, %s2260_s26 }
0x1695   :  { %v1164_v36 = vpop.permute.xlu1 %1163 }
0x1696   :  { %v1166_v63 = vmul.f32 %v1164_v36, %v1144_v34 }
0x1698   :  { %1168 = vrot.lane.b32.xlu2 %v1166_v63, %s2261_s3 }
0x16f2   :  { %v1169_v37 = vpop.permute.xlu2 %1168 }
0x16f3   :  { %1171 = vst.msk [vmem:[#allocation2 + $0x8] sm:$0x3] %vm226_vm6, %v1169_v37  ;;  %1979 = vmatmul.msk.f32.vlgmr.msrb.gmra.mxu1 %vm160_vm7, %v1169_v37 }
0x16fa   :  { %v2637_v38 = vld [vmem:[#allocation2 + $0x8] sm:$0x3] }
0x16fb   :  { %1420 = vst [vmem:[#allocation1 + $0x20] ss:$4 sm:$0xff] %v2637_v38 }
0x1770   :  { %v1191_v39 = vpop.f32.mrf.mxu1 }
0x1771   :  { %v1195_v40 = vrot.slane %v1191_v39, 6 }
0x1773   :  { %v1197_v17 = vadd.f32 %v1195_v40, %v2628_v13 }
0x1775   :  { %2119 = vtanh.f32 %v1197_v17  ;;  %v1980_v55 = vmul.f32 -1.442695, %v1197_v17 }
0x1777   :  { %2121 = vpow2.f32 %v1980_v55 }
0x177b   :  { %v2120_v41 = vpop.eup %2119 }
0x177c   :  { %1223 = vrot.lane.b32.xlu0 %v2120_v41, %s2260_s26 }
0x177d   :  { %v2122_v42 = vpop.eup %2121 }
0x177e   :  { %v1201_v43 = vadd.f32 1.0, %v2122_v42 }
0x1780   :  { %2123 = vrcp.f32 %v1201_v43  ;;  %v1213_v51 = vand.u32 2147483648, %v1201_v43  ;;  %vm1207_vm8 = vweird.f32 %v1201_v43  ;;  %v1211_v52 = vand.u32 2147483647, %v1201_v43 }
0x1782   :  { %v1214_v53 = vor.u32 1.1754944e-38, %v1213_v51  ;;  %vm1212_vm10 = vcmp.eq.f32.partialorder %v1211_v52, 8.507059e+37 }
0x1786   :  { %v2124_v44 = vpop.eup %2123 }
0x1787   :  { %v1203_v45 = vmul.f32 %v2124_v44, %v1201_v43  ;;  %vm1208_vm6 = vweird.f32 %v2124_v44 }
0x1788   :  { %vm1209_vm9 = vmor %vm1207_vm8, %vm1208_vm6 }
0x1789   :  { %v1204_v46 = vsub.f32 1.0, %v1203_v45 }
0x178b   :  { %v1205_v49 = vmul.f32 %v2124_v44, %v1204_v46 }
0x178d   :  { %v1206_v50 = vadd.f32 %v2124_v44, %v1205_v49 }
0x178f   :  { %v1210_v18 = vsel %vm1209_vm9, %v2124_v44, %v1206_v50  ;;  %vm1580_vm9 = vcmask 1041409  }
0x1790   :  { %v1215_v48 = vsel %vm1212_vm10, %v1214_v53, %v1210_v18  ;;  %vm1586_vm10 = vcmask 1044484  }
0x1791   :  { %v1221_v59 = vmul.f32 %v1219_v57, %v1215_v48 }
0x17ee   :  { %v1224_v54 = vpop.permute.xlu0 %1223 }
0x17ef   :  { %v1226_v47 = vmul.f32 %v1224_v54, %v1215_v48 }
0x17f1   :  { %1228 = vrot.lane.b32.xlu1 %v1226_v47, %s2261_s3 }
0x1863   :  { %v1229_v20 = vpop.permute.xlu1 %1228 }
0x1864   :  { %v1231_v0 = vadd.f32 %v1229_v20, %v1221_v59 }
0x1866   :  { %2125 = vtanh.f32 %v1231_v0  ;;  %v1293_v36 = vrot.slane %v1231_v0, 6 }
0x186c   :  { %v2126_v6 = vpop.eup %2125 }
0x186d   :  { %1234 = vrot.lane.b32.xlu2 %v2126_v6, %s2260_s26 }
0x18c7   :  { %v1235_v14 = vpop.permute.xlu2 %1234 }
0x18c8   :  { %v1237_v19 = vmul.f32 %v1235_v14, %v1215_v48 }
0x18ca   :  { %v1243_v21 = vrot.slane %v1237_v19, 2 }
0x18cc   :  { %1244 = vrot.lane.b32.xlu0 %v1243_v21, %s2261_s3 }
0x193e   :  { %v1245_v22 = vpop.permute.xlu0 %1244 }
0x193f   :  { %1981 = vmatmul.msk.f32.vlgmr.msrb.gmra.mxu2 %vm160_vm7, %v1245_v22 }
0x19c2   :  { %v1265_v23 = vpop.f32.mrf.mxu2 }
0x19c3   :  { %v1269_v24 = vrot.slane %v1265_v23, 4 }
0x19c5   :  { %v1271_v58 = vadd.f32 %v1269_v24, %v2628_v13 }
0x19c7   :  { %2127 = vtanh.f32 %v1271_v58  ;;  %v1982_v27 = vmul.f32 -1.442695, %v1271_v58 }
0x19c9   :  { %2129 = vpow2.f32 %v1982_v27 }
0x19cd   :  { %v2128_v26 = vpop.eup %2127 }
0x19ce   :  { %1297 = vrot.lane.b32.xlu1 %v2128_v26, %s2260_s26 }
0x19cf   :  { %v2130_v28 = vpop.eup %2129 }
0x19d0   :  { %v1275_v29 = vadd.f32 1.0, %v2130_v28 }
0x19d2   :  { %2131 = vrcp.f32 %v1275_v29  ;;  %v1287_v34 = vand.u32 2147483648, %v1275_v29  ;;  %vm1281_vm15 = vweird.f32 %v1275_v29  ;;  %v1285_v60 = vand.u32 2147483647, %v1275_v29 }
0x19d4   :  { %v1288_v62 = vor.u32 1.1754944e-38, %v1287_v34  ;;  %vm1286_vm3 = vcmp.eq.f32.partialorder %v1285_v60, 8.507059e+37 }
0x19d8   :  { %v2132_v9 = vpop.eup %2131 }
0x19d9   :  { %v1277_v30 = vmul.f32 %v2132_v9, %v1275_v29  ;;  %vm1282_vm11 = vweird.f32 %v2132_v9 }
0x19da   :  { %vm1283_vm2 = vmor %vm1281_vm15, %vm1282_vm11  ;;  %vm1588_vm11 = vcmask 1045509   ;;  %vm1590_vm15 = vcmask 1046534  }
0x19db   :  { %v1278_v31 = vsub.f32 1.0, %v1277_v30 }
0x19dd   :  { %v1279_v32 = vmul.f32 %v2132_v9, %v1278_v31 }
0x19df   :  { %v1280_v33 = vadd.f32 %v2132_v9, %v1279_v32 }
0x19e1   :  { %v1284_v61 = vsel %vm1283_vm2, %v2132_v9, %v1280_v33  ;;  %v1646_v9 = vrot.slane %v2561_v16, 1  ;;  %vm1592_vm2 = vcmask 1047559  }
0x19e2   :  { %v1289_v12 = vsel %vm1286_vm3, %v1288_v62, %v1284_v61  ;;  %v1403_v62 = vld [vmem:[%s2825_s8 + $0x18] sm:$0xff] }
0x19e3   :  { %v1295_v63 = vmul.f32 %v1293_v36, %v1289_v12  ;;  %1445 = vmatpush.msra.mxu0 %v1403_v62 }
0x1a40   :  { %v1298_v15 = vpop.permute.xlu1 %1297 }
0x1a41   :  { %v1300_v35 = vmul.f32 %v1298_v15, %v1289_v12  ;;  %v1402_v15 = vld [vmem:[%s2825_s8 + $0x10] sm:$0xff] }
0x1a42   :  { %1446 = vmatpush.msra.mxu0 %v1402_v15 }
0x1a43   :  { %1302 = vrot.lane.b32.xlu2 %v1300_v35, %s2261_s3 }
0x1a9d   :  { %v1303_v37 = vpop.permute.xlu2 %1302 }
0x1a9e   :  { %v1305_v39 = vadd.f32 %v1303_v37, %v1295_v63 }
0x1aa0   :  { %2133 = vtanh.f32 %v1305_v39  ;;  %v1367_v22 = vrot.slane %v1305_v39, 6 }
0x1aa6   :  { %v2134_v40 = vpop.eup %2133 }
0x1aa7   :  { %1308 = vrot.lane.b32.xlu0 %v2134_v40, %s2260_s26 }
0x1b19   :  { %v1309_v17 = vpop.permute.xlu0 %1308 }
0x1b1a   :  { %v1311_v41 = vmul.f32 %v1309_v17, %v1289_v12  ;;  %v1399_v12 = vld [vmem:[%s2824_s7] sm:$0xf]  ;;  %v1600_v17 = vrot.slane %v2637_v38, 4 }
0x1b1b   :  { %1987 = vmatpush.msk.msra.mxu1 %vm133_vm0, %v1399_v12 }
0x1b1c   :  { %v1317_v55 = vrot.slane %v1311_v41, 4 }
0x1b1e   :  { %1318 = vrot.lane.b32.xlu1 %v1317_v55, %s2261_s3  ;;  %v1652_v55 = vrot.slane %v2637_v38, 5 }
0x1b90   :  { %v1319_v42 = vpop.permute.xlu1 %1318 }
0x1b91   :  { %1983 = vmatmul.msk.f32.vlgmr.msra.gmra.mxu3 %vm160_vm7, %v1319_v42 }
0x1c14   :  { %v1339_v43 = vpop.f32.mrf.mxu3 }
0x1c15   :  { %v1343_v44 = vrot.slane %v1339_v43, 2 }
0x1c17   :  { %v1345_v45 = vadd.f32 %v1343_v44, %v2628_v13 }
0x1c19   :  { %2135 = vtanh.f32 %v1345_v45  ;;  %v1984_v49 = vmul.f32 -1.442695, %v1345_v45 }
0x1c1b   :  { %2137 = vpow2.f32 %v1984_v49 }
0x1c1f   :  { %v2136_v46 = vpop.eup %2135 }
0x1c20   :  { %1371 = vrot.lane.b32.xlu2 %v2136_v46, %s2260_s26 }
0x1c21   :  { %v2138_v50 = vpop.eup %2137 }
0x1c22   :  { %v1349_v51 = vadd.f32 1.0, %v2138_v50 }
0x1c24   :  { %2139 = vrcp.f32 %v1349_v51  ;;  %v1361_v13 = vand.u32 2147483648, %v1349_v51  ;;  %vm1355_vm5 = vweird.f32 %v1349_v51  ;;  %v1359_v47 = vand.u32 2147483647, %v1349_v51 }
0x1c26   :  { %v1362_v59 = vor.u32 1.1754944e-38, %v1361_v13  ;;  %vm1360_vm8 = vcmp.eq.f32.partialorder %v1359_v47, 8.507059e+37 }
0x1c28   :  { %949 = vrot.lane.b32.xlu2 %v2581_v25, %s2261_s3 }
0x1c2a   :  { %v2140_v52 = vpop.eup %2139 }
0x1c2b   :  { %v1351_v18 = vmul.f32 %v2140_v52, %v1349_v51  ;;  %vm1356_vm4 = vweird.f32 %v2140_v52 }
0x1c2c   :  { %vm1357_vm6 = vmor %vm1355_vm5, %vm1356_vm4 }
0x1c2d   :  { %v1352_v53 = vsub.f32 1.0, %v1351_v18 }
0x1c2f   :  { %v1353_v54 = vmul.f32 %v2140_v52, %v1352_v53 }
0x1c30   :  { %1239 = vrot.lane.b32.xlu2 %v1237_v19, %s2261_s3 }
0x1c31   :  { %v1354_v48 = vadd.f32 %v2140_v52, %v1353_v54 }
0x1c33   :  { %v1358_v57 = vsel %vm1357_vm6, %v2140_v52, %v1354_v48 }
0x1c34   :  { %v1363_v20 = vsel %vm1360_vm8, %v1362_v59, %v1358_v57  ;;  %vm1903_vm8 = vcmask 58368  }
0x1c35   :  { %v1369_v23 = vmul.f32 %v1367_v22, %v1363_v20 }
0x1c7a   :  { %v1372_v25 = vpop.permute.xlu2 %1371 }
0x1c7b   :  { %v1374_v0 = vmul.f32 %v1372_v25, %v1363_v20 }
0x1c7d   :  { %1376 = vrot.lane.b32.xlu0 %v1374_v0, %s2261_s3 }
0x1c82   :  { %v950_v6 = vpop.permute.xlu2 %949 }
0x1c83   :  { %952 = vst.msk [vmem:[#allocation2] sm:$0xc] %vm299_vm12, %v950_v6  ;;  %v2012_v6 = vld [vmem:[%s2826_s9] ss:$0 sm:$0xff] }
0x1c85   :  { %1023 = vrot.lane.b32.xlu0 %v2600_v5, %s2261_s3 }
0x1c8a   :  { %v1392_v14 = vld [vmem:[#allocation2 + $0x2] sm:$0x3]  ;;  %v1240_v19 = vpop.permute.xlu2 %1239 }
0x1c8b   :  { %1414 = vst [vmem:[#allocation1 + $0x1] ss:$4 sm:$0xff] %v1392_v14  ;;  %v1594_v5 = vrot.slane %v1392_v14, 7  ;;  %v1647_v33 = vsel %vm1580_vm9, %v1392_v14, %v1646_v9 }
0x1c8c   :  { %1242 = vst.msk [vmem:[#allocation2 + $0x8] sm:$0xc] %vm299_vm12, %v1240_v19  ;;  %vm1582_vm12 = vcmask 1042434  }
0x1c8d   :  { %1313 = vrot.lane.b32.xlu0 %v1311_v41, %s2261_s3  ;;  %v1595_v32 = vsel %vm1580_vm9, %v1594_v5, %v2561_v16  ;;  %v1401_v16 = vld [vmem:[%s2825_s8 + $0x8] sm:$0xff] }
0x1c8e   :  { %1447 = vmatpush.msra.mxu0 %v1401_v16 }
0x1c93   :  { %v2663_v21 = vld [vmem:[#allocation2 + $0xa] sm:$0x3] }
0x1c94   :  { %1422 = vst [vmem:[#allocation1 + $0x21] ss:$4 sm:$0xff] %v2663_v21  ;;  %v1602_v41 = vrot.slane %v2663_v21, 3  ;;  %v1654_v44 = vrot.slane %v2663_v21, 4 }
0x1cef   :  { %v1377_v24 = vpop.permute.xlu0 %1376 }
0x1cf0   :  { %v1379_v58 = vadd.f32 %v1377_v24, %v1369_v23 }
0x1cf2   :  { %2141 = vtanh.f32 %v1379_v58 }
0x1cf7   :  { %v1024_v26 = vpop.permute.xlu0 %1023 }
0x1cf8   :  { %v2142_v27 = vpop.eup %2141  ;;  %1026 = vst.msk [vmem:[#allocation2] sm:$0x30] %vm375_vm13, %v1024_v26 }
0x1cf9   :  { %1382 = vrot.lane.b32.xlu1 %v2142_v27, %s2260_s26 }
0x1cff   :  { %v1393_v28 = vld [vmem:[#allocation2 + $0x4] sm:$0x3]  ;;  %v1314_v29 = vpop.permute.xlu0 %1313 }
0x1d00   :  { %1416 = vst [vmem:[#allocation1 + $0x2] ss:$4 sm:$0xff] %v1393_v28  ;;  %v1596_v30 = vrot.slane %v1393_v28, 6  ;;  %v1648_v31 = vrot.slane %v1393_v28, 7 }
0x1d01   :  { %1316 = vst.msk [vmem:[#allocation2 + $0x8] sm:$0x30] %vm375_vm13, %v1314_v29  ;;  %1097 = vrot.lane.b32.xlu1 %v2620_v56, %s2261_s3  ;;  %v1400_v56 = vld [vmem:[%s2825_s8] sm:$0xff]  ;;  %vm1584_vm13 = vcmask 1043459  }
0x1d02   :  { %v1597_v34 = vsel %vm1582_vm12, %v1596_v30, %v1595_v32  ;;  %v1649_v60 = vsel %vm1582_vm12, %v1648_v31, %v1647_v33  ;;  %1448 = vmatpush.msra.mxu0 %v1400_v56 }
0x1d08   :  { %v1397_v61 = vld [vmem:[#allocation2 + $0xc] sm:$0x3] }
0x1d09   :  { %1424 = vst [vmem:[#allocation1 + $0x22] ss:$4 sm:$0xff] %v1397_v61  ;;  %v1604_v46 = vrot.slane %v1397_v61, 2  ;;  %v1656_v50 = vrot.slane %v1397_v61, 3 }
0x1d6b   :  { %v1383_v35 = vpop.permute.xlu1 %1382 }
0x1d6c   :  { %v1385_v36 = vmul.f32 %v1383_v35, %v1363_v20 }
0x1d6e   :  { %1387 = vrot.lane.b32.xlu1 %v1385_v36, %s2261_s3 }
0x1d73   :  { %v1098_v63 = vpop.permute.xlu1 %1097 }
0x1d74   :  { %1100 = vst.msk [vmem:[#allocation2] sm:$0xc0] %vm451_vm14, %v1098_v63 }
0x1d7b   :  { %v1394_v37 = vld [vmem:[#allocation2 + $0x6] sm:$0x3] }
0x1d7c   :  { %1418 = vst [vmem:[#allocation1 + $0x3] ss:$4 sm:$0xff] %v1394_v37  ;;  %v1598_v39 = vrot.slane %v1394_v37, 5  ;;  %v1650_v40 = vrot.slane %v1394_v37, 6 }
0x1d7e   :  { %v1599_v42 = vsel %vm1584_vm13, %v1598_v39, %v1597_v34  ;;  %v1651_v43 = vsel %vm1584_vm13, %v1650_v40, %v1649_v60 }
0x1d7f   :  { %v1601_v45 = vsel %vm1586_vm10, %v1600_v17, %v1599_v42  ;;  %v1653_v49 = vsel %vm1586_vm10, %v1652_v55, %v1651_v43 }
0x1d80   :  { %v1603_v51 = vsel %vm1588_vm11, %v1602_v41, %v1601_v45  ;;  %v1655_v52 = vsel %vm1588_vm11, %v1654_v44, %v1653_v49 }
0x1d81   :  { %v1605_v18 = vsel %vm1590_vm15, %v1604_v46, %v1603_v51  ;;  %v1657_v38 = vsel %vm1590_vm15, %v1656_v50, %v1655_v52 }
0x1d83   :  { %v1427_v53 = vld.sshfl [vmem:[#allocation1] sm:$0xff pattern:$0x73625140] }
0x1d84   :  { %1985 = vmatmul.msk.f32.vlgmr.msra.gmra.mxu0 %vm160_vm7, %v1427_v53  ;;  %1456 = vst [vmem:[#allocation1] ss:$4 sm:$0xff] %v2393_v7 }
0x1d85   :  { %1458 = vst [vmem:[#allocation1 + $0x1] ss:$4 sm:$0xff] %v2398_v8 }
0x1d86   :  { %1460 = vst [vmem:[#allocation1 + $0x2] ss:$4 sm:$0xff] %v2407_v10 }
0x1d87   :  { %1462 = vst [vmem:[#allocation1 + $0x3] ss:$4 sm:$0xff] %v2412_v11 }
0x1d8e   :  { %v1471_v54 = vld.sshfl [vmem:[#allocation1] sm:$0xff pattern:$0x73625140] }
0x1d8f   :  { %1988 = vmatmul.msk.f32.vlgmr.msra.gmra.mxu1 %vm128_vm1, %v1471_v54 }
0x1de0   :  { %v1388_v48 = vpop.permute.xlu1 %1387 }
0x1de1   :  { %1390 = vst.msk [vmem:[#allocation2 + $0x8] sm:$0xc0] %vm451_vm14, %v1388_v48  ;;  %vm1509_vm14 = vcmask 64512  }
0x1de8   :  { %v1398_v13 = vld [vmem:[#allocation2 + $0xe] sm:$0x3] }
0x1de9   :  { %1426 = vst [vmem:[#allocation1 + $0x23] ss:$4 sm:$0xff] %v1398_v13  ;;  %v1606_v47 = vrot.slane %v1398_v13, 1  ;;  %v1658_v57 = vrot.slane %v1398_v13, 2 }
0x1deb   :  { %v1607_v59 = vsel %vm1592_vm2, %v1606_v47, %v1605_v18  ;;  %v1659_v25 = vsel %vm1592_vm2, %v1658_v57, %v1657_v38 }
0x1dec   :  { %1626 = vmatpush.msra.mxu2 %v1607_v59  ;;  %1678 = vmatpush.msrb.mxu3 %v1659_v25 }
0x1df0   :  { %v1428_v20 = vld.sshfl [vmem:[#allocation1 + $0x20] sm:$0xff pattern:$0x73625140] }
0x1df1   :  { %1464 = vst [vmem:[#allocation1 + $0x20] ss:$4 sm:$0xff] %v2362_v1  ;;  %1986 = vmatmul.msk.f32.gmra.mxu0 %vm160_vm7, %v1428_v20 }
0x1df2   :  { %1466 = vst [vmem:[#allocation1 + $0x21] ss:$4 sm:$0xff] %v2367_v2 }
0x1df3   :  { %1468 = vst [vmem:[#allocation1 + $0x22] ss:$4 sm:$0xff] %v2373_v3 }
0x1df4   :  { %1470 = vst [vmem:[#allocation1 + $0x23] ss:$4 sm:$0xff] %v2378_v4 }
0x1dfb   :  { %v1472_v0 = vld.sshfl [vmem:[#allocation1 + $0x20] sm:$0xff pattern:$0x73625140] }
0x1dfc   :  { %1989 = vmatmul.msk.f32.gmra.mxu1 %vm128_vm1, %v1472_v0 }
0x1e01   :  { %v1450_v14 = vpop.f32.mrf.mxu0 }
0x1e0c   :  { %v1497_v19 = vpop.f32.mrf.mxu1 }
0x1e0d   :  { %v1498_v21 = vadd.f32 %v1497_v19, %v1450_v14 }
0x1e0f   :  { %v1507_v22 = vadd.f32 %v2012_v6, %v1498_v21 }
0x1e11   :  { %v1510_v23 = vsel %vm1509_vm14, %v1507_v22, -inf }
0x1e12   :  { %1511 = vmax.xlane.f32.xlu2 %v1510_v23 }
0x1e6e   :  { %v1453_v24 = vpop.f32.mrf.mxu0 }
0x1e79   :  { %v1500_v58 = vpop.f32.mrf.mxu1 }
0x1e7a   :  { %v1501_v26 = vadd.f32 %v1500_v58, %v1453_v24 }
0x1e7c   :  { %v1508_v27 = vadd.f32 %v2012_v6, %v1501_v26 }
0x1e7e   :  { %v1513_v5 = vsel %vm1509_vm14, %v1508_v27, -inf }
0x1e7f   :  { %1514 = vmax.xlane.f32.xlu0 %v1513_v5 }
0x1e85   :  { %v1512_v28 = vpop.xlane.xlu2 %1511 }
0x1e86   :  { %v1516_v29 = vsub.f32 %v1507_v22, %v1512_v28 }
0x1e88   :  { %v1518_v9 = vmul.f32 1.442695, %v1516_v29 }
0x1e8a   :  { %2143 = vpow2.f32 %v1518_v9 }
0x1e90   :  { %v2144_v30 = vpop.eup %2143 }
0x1e91   :  { %v1522_v31 = vsel %vm1509_vm14, %v2144_v30, 0.0 }
0x1e92   :  { %1523 = vadd.xlane.f32.xlu1 %v1522_v31 }
0x1ef2   :  { %v1515_v32 = vpop.xlane.xlu0 %1514 }
0x1ef3   :  { %v1517_v33 = vsub.f32 %v1508_v27, %v1515_v32 }
0x1ef5   :  { %v1520_v34 = vmul.f32 1.442695, %v1517_v33 }
0x1ef7   :  { %2145 = vpow2.f32 %v1520_v34 }
0x1efd   :  { %v2146_v60 = vpop.eup %2145 }
0x1efe   :  { %v1525_v61 = vsel %vm1509_vm14, %v2146_v60, 0.0 }
0x1eff   :  { %1526 = vadd.xlane.f32.xlu2 %v1525_v61 }
0x1f05   :  { %v1524_v62 = vpop.xlane.xlu1 %1523 }
0x1f06   :  { %2147 = vrcp.f32 %v1524_v62  ;;  %v1539_v12 = vand.u32 2147483648, %v1524_v62  ;;  %v1537_v36 = vand.u32 2147483647, %v1524_v62  ;;  %vm1533_vm4 = vweird.f32 %v1524_v62 }
0x1f08   :  { %v1540_v37 = vor.u32 1.1754944e-38, %v1539_v12  ;;  %vm1538_vm6 = vcmp.eq.f32.partialorder %v1537_v36, 8.507059e+37  ;;  %v1735_v12 = vld [vmem:[#allocation6 + $0x18] sm:$0xff]  ;;  %v1733_v36 = vld [vmem:[#allocation6 + $0x8] sm:$0xff] }
0x1f09   :  { %1777 = vmatpush.msrb.mxu2 %v1735_v12 }
0x1f0c   :  { %v2148_v15 = vpop.eup %2147 }
0x1f0d   :  { %v1529_v16 = vmul.f32 %v2148_v15, %v1524_v62  ;;  %vm1534_vm3 = vweird.f32 %v2148_v15 }
0x1f0e   :  { %vm1535_vm5 = vmor %vm1533_vm4, %vm1534_vm3 }
0x1f0f   :  { %v1530_v56 = vsub.f32 1.0, %v1529_v16 }
0x1f11   :  { %v1531_v35 = vmul.f32 %v2148_v15, %v1530_v56 }
0x1f13   :  { %v1532_v63 = vadd.f32 %v2148_v15, %v1531_v35  ;;  %v1734_v35 = vld [vmem:[#allocation6 + $0x10] sm:$0xff] }
0x1f14   :  { %1778 = vmatpush.msrb.mxu2 %v1734_v35 }
0x1f15   :  { %v1536_v39 = vsel %vm1535_vm5, %v2148_v15, %v1532_v63  ;;  %v1732_v63 = vld [vmem:[#allocation6] sm:$0xff] }
0x1f16   :  { %v1541_v40 = vsel %vm1538_vm6, %v1540_v37, %v1536_v39  ;;  %1779 = vmatpush.msrb.mxu2 %v1733_v36  ;;  %v1731_v37 = vld [vmem:[%s2827_s10] sm:$0xf] }
0x1f17   :  { %v1542_v17 = vmul.f32 %v2144_v30, %v1541_v40  ;;  %1994 = vmatpush.msk.msra.mxu3 %vm133_vm0, %v1731_v37  ;;  %vm1894_vm0 = vcmask 74752  }
0x1f18   :  { %1780 = vmatpush.msrb.mxu2 %v1732_v63 }
0x1f19   :  { %v1560_v41 = vrot.slane %v1542_v17, 2  ;;  %1904 = vst.msk [vmem:[#allocation9] sm:$0x3] %vm1903_vm8, %v1542_v17  ;;  %v1561_v55 = vrot.slane %v1542_v17, 4  ;;  %v1562_v42 = vrot.slane %v1542_v17, 6  ;;  %v1572_v43 = vperm.slane %v1542_v17, 0 }
0x1f1a   :  { %v1631_v46 = vperm.slane %v1542_v17, 1 }
0x1f1b   :  { %1905 = vst.msk [vmem:[#allocation9 + $0x2] sm:$0x3] %vm1903_vm8, %v1560_v41  ;;  %v1573_v44 = vperm.slane %v1560_v41, 0  ;;  %v1574_v45 = vperm.slane %v1561_v55, 0  ;;  %v1632_v49 = vperm.slane %v1560_v41, 1  ;;  %v1633_v50 = vperm.slane %v1561_v55, 1 }
0x1f1c   :  { %1906 = vst.msk [vmem:[#allocation9 + $0x4] sm:$0x3] %vm1903_vm8, %v1561_v55  ;;  %v1575_v51 = vperm.slane %v1562_v42, 0  ;;  %v1634_v18 = vperm.slane %v1562_v42, 1 }
0x1f1d   :  { %v1581_v52 = vsel %vm1580_vm9, %v1573_v44, %v1572_v43  ;;  %1907 = vst.msk [vmem:[#allocation9 + $0x6] sm:$0x3] %vm1903_vm8, %v1562_v42  ;;  %v1639_v38 = vsel %vm1580_vm9, %v1632_v49, %v1631_v46 }
0x1f1e   :  { %v1583_v53 = vsel %vm1582_vm12, %v1574_v45, %v1581_v52  ;;  %v1640_v54 = vsel %vm1582_vm12, %v1633_v50, %v1639_v38  ;;  %vm1722_vm12 = vcmask 1040384  }
0x1f1f   :  { %v1585_v48 = vsel %vm1584_vm13, %v1575_v51, %v1583_v53  ;;  %v1641_v13 = vsel %vm1584_vm13, %v1634_v18, %v1640_v54 }
0x1f72   :  { %v1527_v47 = vpop.xlane.xlu2 %1526 }
0x1f73   :  { %2149 = vrcp.f32 %v1527_v47  ;;  %v1554_v20 = vand.u32 2147483648, %v1527_v47  ;;  %v1552_v6 = vand.u32 2147483647, %v1527_v47  ;;  %vm1548_vm4 = vweird.f32 %v1527_v47 }
0x1f75   :  { %v1555_v19 = vor.u32 1.1754944e-38, %v1554_v20  ;;  %vm1553_vm5 = vcmp.eq.f32.partialorder %v1552_v6, 8.507059e+37 }
0x1f79   :  { %v2150_v57 = vpop.eup %2149 }
0x1f7a   :  { %v1544_v59 = vmul.f32 %v2150_v57, %v1527_v47  ;;  %vm1549_vm3 = vweird.f32 %v2150_v57 }
0x1f7b   :  { %vm1550_vm9 = vmor %vm1548_vm4, %vm1549_vm3 }
0x1f7c   :  { %v1545_v25 = vsub.f32 1.0, %v1544_v59 }
0x1f7e   :  { %v1546_v0 = vmul.f32 %v2150_v57, %v1545_v25 }
0x1f80   :  { %v1547_v14 = vadd.f32 %v2150_v57, %v1546_v0 }
0x1f82   :  { %v1551_v21 = vsel %vm1550_vm9, %v2150_v57, %v1547_v14 }
0x1f83   :  { %v1556_v22 = vsel %vm1553_vm5, %v1555_v19, %v1551_v21 }
0x1f84   :  { %v1557_v23 = vmul.f32 %v2146_v60, %v1556_v22 }
0x1f86   :  { %1908 = vst.msk [vmem:[#allocation9 + $0x8] sm:$0x3] %vm1903_vm8, %v1557_v23  ;;  %v1563_v24 = vrot.slane %v1557_v23, 2  ;;  %v1564_v58 = vrot.slane %v1557_v23, 4  ;;  %v1565_v26 = vrot.slane %v1557_v23, 6  ;;  %v1576_v27 = vperm.slane %v1557_v23, 0 }
0x1f87   :  { %v1635_v5 = vperm.slane %v1557_v23, 1 }
0x1f88   :  { %v1577_v28 = vperm.slane %v1563_v24, 0  ;;  %v1578_v29 = vperm.slane %v1564_v58, 0  ;;  %v1587_v9 = vsel %vm1586_vm10, %v1576_v27, %v1585_v48  ;;  %1909 = vst.msk [vmem:[#allocation9 + $0xa] sm:$0x3] %vm1903_vm8, %v1563_v24  ;;  %v1636_v30 = vperm.slane %v1563_v24, 1  ;;  %v1846_v48 = vld [vmem:[%s2830_s13 + $0x18] sm:$0xff] }
0x1f89   :  { %1910 = vst.msk [vmem:[#allocation9 + $0xc] sm:$0x3] %vm1903_vm8, %v1564_v58  ;;  %v1637_v31 = vperm.slane %v1564_v58, 1  ;;  %v1642_v32 = vsel %vm1586_vm10, %v1635_v5, %v1641_v13  ;;  %v1579_v33 = vperm.slane %v1565_v26, 0  ;;  %v1638_v61 = vperm.slane %v1565_v26, 1  ;;  %1869 = vmatpush.msrb.mxu0 %v1846_v48 }
0x1f8a   :  { %v1589_v34 = vsel %vm1588_vm11, %v1577_v28, %v1587_v9  ;;  %1911 = vst.msk [vmem:[#allocation9 + $0xe] sm:$0x3] %vm1903_vm8, %v1565_v26  ;;  %v1643_v62 = vsel %vm1588_vm11, %v1636_v30, %v1642_v32 }
0x1f8b   :  { %v1591_v60 = vsel %vm1590_vm15, %v1578_v29, %v1589_v34  ;;  %v1644_v16 = vsel %vm1590_vm15, %v1637_v31, %v1643_v62 }
0x1f8c   :  { %v1593_v15 = vsel %vm1592_vm2, %v1579_v33, %v1591_v60  ;;  %v1645_v56 = vsel %vm1592_vm2, %v1638_v61, %v1644_v16  ;;  %v2014_v33 = vld [vmem:[%s2831_s14] ss:$0 sm:$0xff] }
0x1f8d   :  { %1990 = vmatmul.msk.f32.vlgmr.msra.gmra.mxu2 %vm1509_vm14, %v1593_v15  ;;  %1991 = vmatmul.msk.f32.vlgmr.msrb.gmra.mxu3 %vm1509_vm14, %v1645_v56 }
0x2010   :  { %v1628_v39 = vpop.f32.mrf.mxu2  ;;  %v1680_v40 = vpop.f32.mrf.mxu3 }
0x2011   :  { %v1684_v17 = vrot.slane %v1628_v39, 1  ;;  %v1685_v41 = vrot.slane %v1628_v39, 2  ;;  %v1686_v55 = vrot.slane %v1628_v39, 3  ;;  %v1699_v42 = vrot.slane %v1680_v40, 1 }
0x2012   :  { %v1700_v43 = vrot.slane %v1680_v40, 2  ;;  %v1701_v44 = vrot.slane %v1680_v40, 3  ;;  %v1702_v45 = vrot.slane %v1680_v40, 4  ;;  %v1703_v46 = vrot.slane %v1680_v40, 5 }
0x2013   :  { %v1704_v49 = vrot.slane %v1680_v40, 6  ;;  %v1705_v50 = vrot.slane %v1680_v40, 7  ;;  %v1706_v51 = vperm.slane %v1680_v40, 0  ;;  %v1707_v52 = vperm.slane %v1699_v42, 0 }
0x2014   :  { %v1708_v18 = vperm.slane %v1700_v43, 0  ;;  %v1709_v38 = vperm.slane %v1701_v44, 0  ;;  %v1710_v53 = vperm.slane %v1702_v45, 0  ;;  %v1711_v54 = vperm.slane %v1703_v46, 0 }
0x2015   :  { %v1687_v13 = vrot.slane %v1628_v39, 4  ;;  %v1712_v47 = vperm.slane %v1704_v49, 0  ;;  %v1723_v57 = vsel %vm1722_vm12, %v1628_v39, %v1706_v51  ;;  %v1724_v59 = vsel %vm1722_vm12, %v1684_v17, %v1707_v52 }
0x2016   :  { %v1688_v25 = vrot.slane %v1628_v39, 5  ;;  %v1713_v20 = vperm.slane %v1705_v50, 0  ;;  %v1725_v0 = vsel %vm1722_vm12, %v1685_v41, %v1708_v18  ;;  %v1726_v6 = vsel %vm1722_vm12, %v1686_v55, %v1709_v38  ;;  %1744 = vst [vmem:[#allocation1] ss:$4 sm:$0xff] %v1723_v57 }
0x2017   :  { %v1689_v14 = vrot.slane %v1628_v39, 6  ;;  %v1727_v19 = vsel %vm1722_vm12, %v1687_v13, %v1710_v53  ;;  %1746 = vst [vmem:[#allocation1 + $0x1] ss:$4 sm:$0xff] %v1724_v59  ;;  %v1690_v21 = vrot.slane %v1628_v39, 7 }
0x2018   :  { %v1728_v22 = vsel %vm1722_vm12, %v1688_v25, %v1711_v54  ;;  %1748 = vst [vmem:[#allocation1 + $0x2] ss:$4 sm:$0xff] %v1725_v0 }
0x2019   :  { %v1729_v23 = vsel %vm1722_vm12, %v1689_v14, %v1712_v47  ;;  %1750 = vst [vmem:[#allocation1 + $0x3] ss:$4 sm:$0xff] %v1726_v6  ;;  %v1730_v24 = vsel %vm1722_vm12, %v1690_v21, %v1713_v20 }
0x201a   :  { %1752 = vst [vmem:[#allocation1 + $0x20] ss:$4 sm:$0xff] %v1727_v19 }
0x201b   :  { %1754 = vst [vmem:[#allocation1 + $0x21] ss:$4 sm:$0xff] %v1728_v22 }
0x201c   :  { %1756 = vst [vmem:[#allocation1 + $0x22] ss:$4 sm:$0xff] %v1729_v23 }
0x201d   :  { %1758 = vst [vmem:[#allocation1 + $0x23] ss:$4 sm:$0xff] %v1730_v24 }
0x2020   :  { %v1759_v58 = vld.sshfl [vmem:[#allocation1] sm:$0xff pattern:$0x73625140] }
0x2021   :  { %1992 = vmatmul.msk.f32.vlgmr.msrb.gmra.mxu2 %vm160_vm7, %v1759_v58  ;;  %1788 = vst [vmem:[#allocation1] ss:$4 sm:$0xff] %v2393_v7 }
0x2022   :  { %1790 = vst [vmem:[#allocation1 + $0x1] ss:$4 sm:$0xff] %v2398_v8  ;;  %v1845_v8 = vld [vmem:[%s2830_s13 + $0x10] sm:$0xff] }
0x2023   :  { %1792 = vst [vmem:[#allocation1 + $0x2] ss:$4 sm:$0xff] %v2407_v10  ;;  %1870 = vmatpush.msrb.mxu0 %v1845_v8 }
0x2024   :  { %1794 = vst [vmem:[#allocation1 + $0x3] ss:$4 sm:$0xff] %v2412_v11  ;;  %v1760_v26 = vld.sshfl [vmem:[#allocation1 + $0x20] sm:$0xff pattern:$0x73625140] }
0x2025   :  { %1796 = vst [vmem:[#allocation1 + $0x20] ss:$4 sm:$0xff] %v2362_v1  ;;  %v1844_v1 = vld [vmem:[%s2830_s13 + $0x8] sm:$0xff] }
0x2026   :  { %1798 = vst [vmem:[#allocation1 + $0x21] ss:$4 sm:$0xff] %v2367_v2  ;;  %1871 = vmatpush.msrb.mxu0 %v1844_v1  ;;  %v1843_v2 = vld [vmem:[%s2830_s13] sm:$0xff]  ;;  %s2262_s13 = smov [#allocation9]  }
0x2027   :  { %1800 = vst [vmem:[#allocation1 + $0x22] ss:$4 sm:$0xff] %v2373_v3  ;;  %s1929_s18 = sshll.u32 %s2262_s13, 4  ;;  %s1930_s18 = int_to_ptr.vmem [resolvable:$true] %s1929_s18 }
0x2028   :  { %1802 = vst [vmem:[#allocation1 + $0x23] ss:$4 sm:$0xff] %v2378_v4  ;;  %1872 = vmatpush.msrb.mxu0 %v1843_v2  ;;  %v2013_v4 = vld [vmem:[%s2829_s12] ss:$0 sm:$0xff]  ;;  %s1931_s12 = sshll.u32 %s2833_s16, 4  ;;  %s2264_s16 = smov [#allocation8]   ;;  %s1932_s12 = int_to_ptr.hbm [resolvable:$true] %s1931_s12 }
0x2029   :  { %1993 = vmatmul.msk.f32.gmra.mxu2 %vm160_vm7, %v1760_v26  ;;  %1937 = dma.vmem_to_hbm [thread:$0]  %s1930_s18, 256, %s1932_s12, [#allocation10], %s2261_s3, %s2261_s3, %s2263_s20  }
0x202a   :  { %s1916_s23 = sshll.u32 %s2264_s16, 4  ;;  %s1917_s23 = int_to_ptr.vmem [resolvable:$true] %s1916_s23 }
0x202b   :  { %v1803_v27 = vld.sshfl [vmem:[#allocation1] sm:$0xff pattern:$0x73625140] }
0x202c   :  { %1995 = vmatmul.msk.f32.vlgmr.msra.gmra.mxu3 %vm128_vm1, %v1803_v27 }
0x202f   :  { %v1804_v7 = vld.sshfl [vmem:[#allocation1 + $0x20] sm:$0xff pattern:$0x73625140] }
0x2034   :  { %1996 = vmatmul.msk.f32.gmra.mxu3 %vm128_vm1, %v1804_v7 }
0x20a4   :  { %v1782_v3 = vpop.f32.mrf.mxu2 }
0x20ac   :  { %v1785_v29 = vpop.f32.mrf.mxu2 }
0x20af   :  { %v1829_v10 = vpop.f32.mrf.mxu3 }
0x20b0   :  { %v1830_v11 = vadd.f32 %v1829_v10, %v1782_v3 }
0x20b2   :  { %v1839_v5 = vadd.f32 %v2013_v4, %v1830_v11 }
0x20b4   :  { %v1841_v28 = vmax.f32 %v1839_v5, 0.0 }
0x20b6   :  { %1997 = vmatmul.msk.f32.vlgmr.msrb.gmra.mxu0 %vm160_vm7, %v1841_v28 }
0x20b7   :  { %v1832_v9 = vpop.f32.mrf.mxu3 }
0x20b8   :  { %v1833_v30 = vadd.f32 %v1832_v9, %v1785_v29 }
0x20ba   :  { %v1840_v31 = vadd.f32 %v2013_v4, %v1833_v30 }
0x20bc   :  { %v1842_v32 = vmax.f32 %v1840_v31, 0.0 }
0x20be   :  { %1998 = vmatmul.msk.f32.gmra.mxu0 %vm160_vm7, %v1842_v32 }
0x2133   :  { %v1874_v34 = vpop.f32.mrf.mxu0 }
0x2134   :  { %v1875_v60 = vadd.f32 %v2014_v33, %v1874_v34 }
0x2136   :  { %v1882_v61 = vrot.slane %v1875_v60, 2  ;;  %v1883_v62 = vrot.slane %v1875_v60, 4  ;;  %v1884_v15 = vrot.slane %v1875_v60, 6  ;;  %1895 = vst.msk [vmem:[#allocation8] sm:$0x3] %vm1894_vm0, %v1875_v60 }
0x2138   :  { %1896 = vst.msk [vmem:[#allocation8 + $0x2] sm:$0x3] %vm1894_vm0, %v1882_v61 }
0x2139   :  { %1897 = vst.msk [vmem:[#allocation8 + $0x4] sm:$0x3] %vm1894_vm0, %v1883_v62 }
0x213a   :  { %1898 = vst.msk [vmem:[#allocation8 + $0x6] sm:$0x3] %vm1894_vm0, %v1884_v15 }
0x213b   :  { %v1877_v16 = vpop.f32.mrf.mxu0 }
0x213c   :  { %v1878_v56 = vadd.f32 %v2014_v33, %v1877_v16 }
0x213e   :  { %v1885_v12 = vrot.slane %v1878_v56, 2  ;;  %v1886_v35 = vrot.slane %v1878_v56, 4  ;;  %v1887_v36 = vrot.slane %v1878_v56, 6  ;;  %1899 = vst.msk [vmem:[#allocation8 + $0x8] sm:$0x3] %vm1894_vm0, %v1878_v56 }
0x2140   :  { %1900 = vst.msk [vmem:[#allocation8 + $0xa] sm:$0x3] %vm1894_vm0, %v1885_v12 }
0x2141   :  { %1901 = vst.msk [vmem:[#allocation8 + $0xc] sm:$0x3] %vm1894_vm0, %v1886_v35 }
0x2142   :  { %1902 = vst.msk [vmem:[#allocation8 + $0xe] sm:$0x3] %vm1894_vm0, %v1887_v36 }
0x2143   :  { %1924 = dma.vmem_to_hbm [thread:$0]  %s1917_s23, 256, %s1919_s25, [#allocation5], %s2261_s3, %s2261_s3, %s2263_s20  }
0x2144   :  { %2251 = dma.done.wait [#allocation5], 256  }
0x2145   :  { %2252 = vsyncadd [#allocation5], 4294967040 }
0x2146   :  { %2253 = dma.done.wait [#allocation10], 256  }
0x2147   :  { %2254 = vsyncadd [#allocation10], 4294967040 }
0x2148   :  { %1946 = vsyncpa [#allocation4], 1 }
0x2149   :  { %1947 = vsyncpa [#allocation7], 1 }
0x214a   :  { %1948 = vsyncpa [#allocation5], 1 }
0x214b   :  { %1949 = vsyncpa [#allocation10], 1 }

</bundles_post_ra>
